<compile_context>
chip_gen: v7x
topology: tpu7x:2x2x1
jax: 0.10.0
libtpu: 0.0.40
codegen_flags: <defaults>
</compile_context>

<pallas_src>
import jax
import jax.numpy as jnp
from jax import lax
from jax.experimental import pallas as pl
from jax.experimental.pallas import tpu as pltpu


def wistar_kernel(x_ref,                       # (T*B, I) time-major rows
                  wih0_ref, whh0_ref, b0_ref,  # (I,4H), (H,4H), (1,4H)
                  wih1_ref, whh1_ref, b1_ref,  # (H,4H), (H,4H), (1,4H)
                  wfc1_ref, bfc1_ref,          # (H,H), (1,H)
                  wfc2_ref, bfc2_ref,          # (H,A), (1,A)
                  out_ref):                    # (B, A)
    B = out_ref.shape[0]
    TB, _ = x_ref.shape
    T = TB // B
    H = whh0_ref.shape[0]
    G = 4 * H

    whh0 = whh0_ref[...]
    wih1 = wih1_ref[...]
    whh1 = whh1_ref[...]
    b1 = b1_ref[...]

    # ---- hoisted layer-0 input projection: one well-shaped MXU call ----
    xg0_all = (jnp.dot(x_ref[...], wih0_ref[...],
                       preferred_element_type=jnp.float32)
               + b0_ref[...])                               # (T*B, 4H)

    # ---- constants for full-vreg gate activation (hoisted out of the loop) ----
    lane = lax.broadcasted_iota(jnp.int32, (B, G), 1)
    g_mask = (lane >= 2 * H) & (lane < 3 * H)               # tanh block (g gate)
    scale = jnp.where(g_mask, jnp.float32(1.0), jnp.float32(0.5))

    def activate(gates):
        # One tanh over the whole (B, 4H) vreg:
        #   g lanes   : tanh(x)
        #   i/f/o lanes: sigmoid(x) = 0.5*tanh(0.5*x) + 0.5
        t = jnp.tanh(gates * scale)
        return jnp.where(g_mask, t, 0.5 * t + 0.5)

    def cell_update(act, c_prev):
        i = act[:, 0:H]
        f = act[:, H:2 * H]
        g = act[:, 2 * H:3 * H]
        o = act[:, 3 * H:4 * H]
        c = f * c_prev + i * g
        h = o * jnp.tanh(c)
        return h, c

    zeros = jnp.zeros((B, H), jnp.float32)
    h0, c0, h1, c1 = zeros, zeros, zeros, zeros

    # T is static -> fully unrolled recurrence (scheduler sees the whole chain).
    for t in range(T):
        # layer 0: only the recurrent matmul remains on the critical path
        gates0 = xg0_all[t * B:(t + 1) * B, :] + jnp.dot(
            h0, whh0, preferred_element_type=jnp.float32)
        h0, c0 = cell_update(activate(gates0), c0)

        # layer 1: h1@whh1 depends only on the previous step and overlaps with
        # layer-0 work once unrolled; h0@wih1 is the only serial dependency.
        gates1 = (jnp.dot(h0, wih1, preferred_element_type=jnp.float32)
                  + jnp.dot(h1, whh1, preferred_element_type=jnp.float32)
                  + b1)
        h1, c1 = cell_update(activate(gates1), c1)

    # fc1 -> dropout (eval: identity) -> relu -> fc2 -> log_softmax(dim=1)
    h = jnp.dot(h1, wfc1_ref[...], preferred_element_type=jnp.float32) + bfc1_ref[...]
    h = jnp.maximum(h, 0.0)
    logits = jnp.dot(h, wfc2_ref[...], preferred_element_type=jnp.float32) + bfc2_ref[...]
    m = jnp.max(logits, axis=1, keepdims=True)
    z = logits - m
    out_ref[...] = z - jnp.log(jnp.sum(jnp.exp(z), axis=1, keepdims=True))


def init_params(key, input_size, hidden_size, n_adl):
    """Deterministic PyTorch-style uniform(-1/sqrt(H), 1/sqrt(H)) init."""
    H = hidden_size
    k = 1.0 / jnp.sqrt(jnp.float32(H))
    keys = jax.random.split(key, 12)

    def u(kk, shape):
        return jax.random.uniform(kk, shape, jnp.float32, -k, k)

    return {
        # LSTM layer 0 (input_size -> H), PyTorch shapes (4H, in), gate order i,f,g,o
        "w_ih_l0": u(keys[0], (4 * H, input_size)),
        "w_hh_l0": u(keys[1], (4 * H, H)),
        "b_ih_l0": u(keys[2], (4 * H,)),
        "b_hh_l0": u(keys[3], (4 * H,)),
        # LSTM layer 1 (H -> H)
        "w_ih_l1": u(keys[4], (4 * H, H)),
        "w_hh_l1": u(keys[5], (4 * H, H)),
        "b_ih_l1": u(keys[6], (4 * H,)),
        "b_hh_l1": u(keys[7], (4 * H,)),
        # fc1 (H -> H), fc2 (H -> n_adl)
        "fc1_w": u(keys[8], (H, H)),
        "fc1_b": u(keys[9], (H,)),
        "fc2_w": u(keys[10], (n_adl, H)),
        "fc2_b": u(keys[11], (n_adl,)),
    }


@jax.jit
def wistar_forward(x, p):
    """x: (B, T, input_size) batch-first, like the PyTorch module."""
    B, T, I = x.shape
    H = p["fc1_w"].shape[0]
    A = p["fc2_w"].shape[0]

    # Glue: time-major row layout (so per-step slices in the kernel are
    # sublane-aligned), pre-transposed weights, fused LSTM biases.
    xt = jnp.transpose(x, (1, 0, 2)).reshape(T * B, I).astype(jnp.float32)
    wih0 = p["w_ih_l0"].T                                    # (I, 4H)
    whh0 = p["w_hh_l0"].T                                    # (H, 4H)
    b0 = (p["b_ih_l0"] + p["b_hh_l0"]).reshape(1, 4 * H)
    wih1 = p["w_ih_l1"].T                                    # (H, 4H)
    whh1 = p["w_hh_l1"].T                                    # (H, 4H)
    b1 = (p["b_ih_l1"] + p["b_hh_l1"]).reshape(1, 4 * H)
    wfc1 = p["fc1_w"].T                                      # (H, H)
    bfc1 = p["fc1_b"].reshape(1, H)
    wfc2 = p["fc2_w"].T                                      # (H, A)
    bfc2 = p["fc2_b"].reshape(1, A)

    vmem = pl.BlockSpec(memory_space=pltpu.MemorySpace.VMEM)
    return pl.pallas_call(
        wistar_kernel,
        out_shape=jax.ShapeDtypeStruct((B, A), jnp.float32),
        in_specs=[vmem] * 11,
        out_specs=vmem,
    )(xt, wih0, whh0, b0, wih1, whh1, b1, wfc1, bfc1, wfc2, bfc2)


def wistar_reference(x, p):
    """Pure-JAX reference for validation (same math, batch-first input)."""
    H = p["fc1_w"].shape[0]
    B = x.shape[0]

    def cell(x_t, h, c, w_ih, w_hh, b_ih, b_hh):
        gates = x_t @ w_ih.T + h @ w_hh.T + b_ih + b_hh
        i = jax.nn.sigmoid(gates[:, 0:H])
        f = jax.nn.sigmoid(gates[:, H:2 * H])
        g = jnp.tanh(gates[:, 2 * H:3 * H])
        o = jax.nn.sigmoid(gates[:, 3 * H:4 * H])
        c = f * c + i * g
        return o * jnp.tanh(c), c

    def scan_fn(carry, x_t):
        h0, c0, h1, c1 = carry
        h0, c0 = cell(x_t, h0, c0, p["w_ih_l0"], p["w_hh_l0"], p["b_ih_l0"], p["b_hh_l0"])
        h1, c1 = cell(h0, h1, c1, p["w_ih_l1"], p["w_hh_l1"], p["b_ih_l1"], p["b_hh_l1"])
        return (h0, c0, h1, c1), None

    z = jnp.zeros((B, H), jnp.float32)
    (h0, c0, h1, c1), _ = lax.scan(scan_fn, (z, z, z, z), jnp.transpose(x, (1, 0, 2)))
    h = jnp.maximum(h1 @ p["fc1_w"].T + p["fc1_b"], 0.0)
    logits = h @ p["fc2_w"].T + p["fc2_b"]
    return jax.nn.log_softmax(logits, axis=1)


if __name__ == "__main__":
    B, T = 8, 8            # batch, sequence length
    input_size = 16
    hidden_size = 32
    n_adl = 8              # number of output classes

    key = jax.random.PRNGKey(0)
    kx, kp = jax.random.split(key)
    x = jax.random.normal(kx, (B, T, input_size), jnp.float32)
    params = init_params(kp, input_size, hidden_size, n_adl)

    y = wistar_forward(x, params)
    y = jax.block_until_ready(y)

    y_ref = wistar_reference(x, params)
    assert y.shape == (B, n_adl)
    assert jnp.allclose(y, y_ref, atol=1e-4, rtol=1e-4), "mismatch vs JAX reference"

    print("KERNEL_OK")
</pallas_src>

<mosaic_0001>
module attributes {stable_mosaic.version = 11 : i64} {
  func.func @wistar_kernel(%arg0: memref<64x16xf32, #tpu.memory_space<vmem>>, %arg1: memref<16x128xf32, #tpu.memory_space<vmem>>, %arg2: memref<32x128xf32, #tpu.memory_space<vmem>>, %arg3: memref<1x128xf32, #tpu.memory_space<vmem>>, %arg4: memref<32x128xf32, #tpu.memory_space<vmem>>, %arg5: memref<32x128xf32, #tpu.memory_space<vmem>>, %arg6: memref<1x128xf32, #tpu.memory_space<vmem>>, %arg7: memref<32x32xf32, #tpu.memory_space<vmem>>, %arg8: memref<1x32xf32, #tpu.memory_space<vmem>>, %arg9: memref<32x8xf32, #tpu.memory_space<vmem>>, %arg10: memref<1x8xf32, #tpu.memory_space<vmem>>, %arg11: memref<8x8xf32, #tpu.memory_space<vmem>>) attributes {dimension_semantics = [], scalar_prefetch = 0 : i64, scratch_operands = 0 : i64, tpu.core_type = #tpu.core_type<tc>} {
    %c0 = arith.constant 0 : index
    %c0_0 = arith.constant 0 : index
    %0 = vector.load %arg2[%c0, %c0_0] : memref<32x128xf32, #tpu.memory_space<vmem>>, vector<32x128xf32>
    %c0_1 = arith.constant 0 : index
    %c0_2 = arith.constant 0 : index
    %1 = vector.load %arg4[%c0_1, %c0_2] : memref<32x128xf32, #tpu.memory_space<vmem>>, vector<32x128xf32>
    %c0_3 = arith.constant 0 : index
    %c0_4 = arith.constant 0 : index
    %2 = vector.load %arg5[%c0_3, %c0_4] : memref<32x128xf32, #tpu.memory_space<vmem>>, vector<32x128xf32>
    %c0_5 = arith.constant 0 : index
    %c0_6 = arith.constant 0 : index
    %3 = vector.load %arg6[%c0_5, %c0_6] : memref<1x128xf32, #tpu.memory_space<vmem>>, vector<1x128xf32>
    %c0_7 = arith.constant 0 : index
    %c0_8 = arith.constant 0 : index
    %4 = vector.load %arg0[%c0_7, %c0_8] : memref<64x16xf32, #tpu.memory_space<vmem>>, vector<64x16xf32>
    %c0_9 = arith.constant 0 : index
    %c0_10 = arith.constant 0 : index
    %5 = vector.load %arg1[%c0_9, %c0_10] : memref<16x128xf32, #tpu.memory_space<vmem>>, vector<16x128xf32>
    %cst = arith.constant dense<0.000000e+00> : vector<64x128xf32>
    %6 = tpu.matmul %4, %5, %cst {dimension_numbers = #tpu.dot_dimension_numbers<[1], [0], [0], [1], [0, 0, 1, 1], [], []>} : vector<64x16xf32>, vector<16x128xf32>, vector<64x128xf32> -> vector<64x128xf32>
    %c0_11 = arith.constant 0 : index
    %c0_12 = arith.constant 0 : index
    %7 = vector.load %arg3[%c0_11, %c0_12] : memref<1x128xf32, #tpu.memory_space<vmem>>, vector<1x128xf32>
    %8 = vector.broadcast %7 : vector<1x128xf32> to vector<64x128xf32>
    %9 = arith.addf %6, %8 : vector<64x128xf32>
    %10 = tpu.iota {dimensions = array<i32: 1>} : vector<8x128xi32>
    %c64_i32 = arith.constant 64 : i32
    %11 = vector.broadcast %c64_i32 : i32 to vector<8x128xi32>
    %12 = arith.cmpi sge, %10, %11 : vector<8x128xi32>
    %c96_i32 = arith.constant 96 : i32
    %13 = vector.broadcast %c96_i32 : i32 to vector<8x128xi32>
    %14 = arith.cmpi slt, %10, %13 : vector<8x128xi32>
    %15 = arith.andi %12, %14 : vector<8x128xi1>
    %cst_13 = arith.constant 1.000000e+00 : f32
    %cst_14 = arith.constant 5.000000e-01 : f32
    %16 = vector.broadcast %cst_13 : f32 to vector<8x128xf32>
    %17 = vector.broadcast %cst_14 : f32 to vector<8x128xf32>
    %18 = arith.select %15, %16, %17 : vector<8x128xi1>, vector<8x128xf32>
    %cst_15 = arith.constant 0.000000e+00 : f32
    %19 = vector.broadcast %cst_15 : f32 to vector<8x32xf32>
    %20 = vector.extract_strided_slice %9 {offsets = [0, 0], sizes = [8, 128], strides = [1, 1]} : vector<64x128xf32> to vector<8x128xf32>
    %cst_16 = arith.constant dense<0.000000e+00> : vector<8x128xf32>
    %21 = tpu.matmul %19, %0, %cst_16 {dimension_numbers = #tpu.dot_dimension_numbers<[1], [0], [0], [1], [0, 0, 1, 1], [], []>} : vector<8x32xf32>, vector<32x128xf32>, vector<8x128xf32> -> vector<8x128xf32>
    %22 = arith.addf %20, %21 : vector<8x128xf32>
    %23 = arith.mulf %22, %18 : vector<8x128xf32>
    %24 = math.tanh %23 : vector<8x128xf32>
    %cst_17 = arith.constant 5.000000e-01 : f32
    %25 = vector.broadcast %cst_17 : f32 to vector<8x128xf32>
    %26 = arith.mulf %25, %24 : vector<8x128xf32>
    %cst_18 = arith.constant 5.000000e-01 : f32
    %27 = vector.broadcast %cst_18 : f32 to vector<8x128xf32>
    %28 = arith.addf %26, %27 : vector<8x128xf32>
    %29 = arith.select %15, %24, %28 : vector<8x128xi1>, vector<8x128xf32>
    %30 = vector.extract_strided_slice %29 {offsets = [0, 0], sizes = [8, 32], strides = [1, 1]} : vector<8x128xf32> to vector<8x32xf32>
    %31 = vector.extract_strided_slice %29 {offsets = [0, 32], sizes = [8, 32], strides = [1, 1]} : vector<8x128xf32> to vector<8x32xf32>
    %32 = vector.extract_strided_slice %29 {offsets = [0, 64], sizes = [8, 32], strides = [1, 1]} : vector<8x128xf32> to vector<8x32xf32>
    %33 = vector.extract_strided_slice %29 {offsets = [0, 96], sizes = [8, 32], strides = [1, 1]} : vector<8x128xf32> to vector<8x32xf32>
    %34 = arith.mulf %31, %19 : vector<8x32xf32>
    %35 = arith.mulf %30, %32 : vector<8x32xf32>
    %36 = arith.addf %34, %35 : vector<8x32xf32>
    %37 = math.tanh %36 : vector<8x32xf32>
    %38 = arith.mulf %33, %37 : vector<8x32xf32>
    %cst_19 = arith.constant dense<0.000000e+00> : vector<8x128xf32>
    %39 = tpu.matmul %38, %1, %cst_19 {dimension_numbers = #tpu.dot_dimension_numbers<[1], [0], [0], [1], [0, 0, 1, 1], [], []>} : vector<8x32xf32>, vector<32x128xf32>, vector<8x128xf32> -> vector<8x128xf32>
    %cst_20 = arith.constant dense<0.000000e+00> : vector<8x128xf32>
    %40 = tpu.matmul %19, %2, %cst_20 {dimension_numbers = #tpu.dot_dimension_numbers<[1], [0], [0], [1], [0, 0, 1, 1], [], []>} : vector<8x32xf32>, vector<32x128xf32>, vector<8x128xf32> -> vector<8x128xf32>
    %41 = arith.addf %39, %40 : vector<8x128xf32>
    %42 = vector.broadcast %3 : vector<1x128xf32> to vector<8x128xf32>
    %43 = arith.addf %41, %42 : vector<8x128xf32>
    %44 = arith.mulf %43, %18 : vector<8x128xf32>
    %45 = math.tanh %44 : vector<8x128xf32>
    %cst_21 = arith.constant 5.000000e-01 : f32
    %46 = vector.broadcast %cst_21 : f32 to vector<8x128xf32>
    %47 = arith.mulf %46, %45 : vector<8x128xf32>
    %cst_22 = arith.constant 5.000000e-01 : f32
    %48 = vector.broadcast %cst_22 : f32 to vector<8x128xf32>
    %49 = arith.addf %47, %48 : vector<8x128xf32>
    %50 = arith.select %15, %45, %49 : vector<8x128xi1>, vector<8x128xf32>
    %51 = vector.extract_strided_slice %50 {offsets = [0, 0], sizes = [8, 32], strides = [1, 1]} : vector<8x128xf32> to vector<8x32xf32>
    %52 = vector.extract_strided_slice %50 {offsets = [0, 32], sizes = [8, 32], strides = [1, 1]} : vector<8x128xf32> to vector<8x32xf32>
    %53 = vector.extract_strided_slice %50 {offsets = [0, 64], sizes = [8, 32], strides = [1, 1]} : vector<8x128xf32> to vector<8x32xf32>
    %54 = vector.extract_strided_slice %50 {offsets = [0, 96], sizes = [8, 32], strides = [1, 1]} : vector<8x128xf32> to vector<8x32xf32>
    %55 = arith.mulf %52, %19 : vector<8x32xf32>
    %56 = arith.mulf %51, %53 : vector<8x32xf32>
    %57 = arith.addf %55, %56 : vector<8x32xf32>
    %58 = math.tanh %57 : vector<8x32xf32>
    %59 = arith.mulf %54, %58 : vector<8x32xf32>
    %60 = vector.extract_strided_slice %9 {offsets = [8, 0], sizes = [8, 128], strides = [1, 1]} : vector<64x128xf32> to vector<8x128xf32>
    %cst_23 = arith.constant dense<0.000000e+00> : vector<8x128xf32>
    %61 = tpu.matmul %38, %0, %cst_23 {dimension_numbers = #tpu.dot_dimension_numbers<[1], [0], [0], [1], [0, 0, 1, 1], [], []>} : vector<8x32xf32>, vector<32x128xf32>, vector<8x128xf32> -> vector<8x128xf32>
    %62 = arith.addf %60, %61 : vector<8x128xf32>
    %63 = arith.mulf %62, %18 : vector<8x128xf32>
    %64 = math.tanh %63 : vector<8x128xf32>
    %cst_24 = arith.constant 5.000000e-01 : f32
    %65 = vector.broadcast %cst_24 : f32 to vector<8x128xf32>
    %66 = arith.mulf %65, %64 : vector<8x128xf32>
    %cst_25 = arith.constant 5.000000e-01 : f32
    %67 = vector.broadcast %cst_25 : f32 to vector<8x128xf32>
    %68 = arith.addf %66, %67 : vector<8x128xf32>
    %69 = arith.select %15, %64, %68 : vector<8x128xi1>, vector<8x128xf32>
    %70 = vector.extract_strided_slice %69 {offsets = [0, 0], sizes = [8, 32], strides = [1, 1]} : vector<8x128xf32> to vector<8x32xf32>
    %71 = vector.extract_strided_slice %69 {offsets = [0, 32], sizes = [8, 32], strides = [1, 1]} : vector<8x128xf32> to vector<8x32xf32>
    %72 = vector.extract_strided_slice %69 {offsets = [0, 64], sizes = [8, 32], strides = [1, 1]} : vector<8x128xf32> to vector<8x32xf32>
    %73 = vector.extract_strided_slice %69 {offsets = [0, 96], sizes = [8, 32], strides = [1, 1]} : vector<8x128xf32> to vector<8x32xf32>
    %74 = arith.mulf %71, %36 : vector<8x32xf32>
    %75 = arith.mulf %70, %72 : vector<8x32xf32>
    %76 = arith.addf %74, %75 : vector<8x32xf32>
    %77 = math.tanh %76 : vector<8x32xf32>
    %78 = arith.mulf %73, %77 : vector<8x32xf32>
    %cst_26 = arith.constant dense<0.000000e+00> : vector<8x128xf32>
    %79 = tpu.matmul %78, %1, %cst_26 {dimension_numbers = #tpu.dot_dimension_numbers<[1], [0], [0], [1], [0, 0, 1, 1], [], []>} : vector<8x32xf32>, vector<32x128xf32>, vector<8x128xf32> -> vector<8x128xf32>
    %cst_27 = arith.constant dense<0.000000e+00> : vector<8x128xf32>
    %80 = tpu.matmul %59, %2, %cst_27 {dimension_numbers = #tpu.dot_dimension_numbers<[1], [0], [0], [1], [0, 0, 1, 1], [], []>} : vector<8x32xf32>, vector<32x128xf32>, vector<8x128xf32> -> vector<8x128xf32>
    %81 = arith.addf %79, %80 : vector<8x128xf32>
    %82 = vector.broadcast %3 : vector<1x128xf32> to vector<8x128xf32>
    %83 = arith.addf %81, %82 : vector<8x128xf32>
    %84 = arith.mulf %83, %18 : vector<8x128xf32>
    %85 = math.tanh %84 : vector<8x128xf32>
    %cst_28 = arith.constant 5.000000e-01 : f32
    %86 = vector.broadcast %cst_28 : f32 to vector<8x128xf32>
    %87 = arith.mulf %86, %85 : vector<8x128xf32>
    %cst_29 = arith.constant 5.000000e-01 : f32
    %88 = vector.broadcast %cst_29 : f32 to vector<8x128xf32>
    %89 = arith.addf %87, %88 : vector<8x128xf32>
    %90 = arith.select %15, %85, %89 : vector<8x128xi1>, vector<8x128xf32>
    %91 = vector.extract_strided_slice %90 {offsets = [0, 0], sizes = [8, 32], strides = [1, 1]} : vector<8x128xf32> to vector<8x32xf32>
    %92 = vector.extract_strided_slice %90 {offsets = [0, 32], sizes = [8, 32], strides = [1, 1]} : vector<8x128xf32> to vector<8x32xf32>
    %93 = vector.extract_strided_slice %90 {offsets = [0, 64], sizes = [8, 32], strides = [1, 1]} : vector<8x128xf32> to vector<8x32xf32>
    %94 = vector.extract_strided_slice %90 {offsets = [0, 96], sizes = [8, 32], strides = [1, 1]} : vector<8x128xf32> to vector<8x32xf32>
    %95 = arith.mulf %92, %57 : vector<8x32xf32>
    %96 = arith.mulf %91, %93 : vector<8x32xf32>
    %97 = arith.addf %95, %96 : vector<8x32xf32>
    %98 = math.tanh %97 : vector<8x32xf32>
    %99 = arith.mulf %94, %98 : vector<8x32xf32>
    %100 = vector.extract_strided_slice %9 {offsets = [16, 0], sizes = [8, 128], strides = [1, 1]} : vector<64x128xf32> to vector<8x128xf32>
    %cst_30 = arith.constant dense<0.000000e+00> : vector<8x128xf32>
    %101 = tpu.matmul %78, %0, %cst_30 {dimension_numbers = #tpu.dot_dimension_numbers<[1], [0], [0], [1], [0, 0, 1, 1], [], []>} : vector<8x32xf32>, vector<32x128xf32>, vector<8x128xf32> -> vector<8x128xf32>
    %102 = arith.addf %100, %101 : vector<8x128xf32>
    %103 = arith.mulf %102, %18 : vector<8x128xf32>
    %104 = math.tanh %103 : vector<8x128xf32>
    %cst_31 = arith.constant 5.000000e-01 : f32
    %105 = vector.broadcast %cst_31 : f32 to vector<8x128xf32>
    %106 = arith.mulf %105, %104 : vector<8x128xf32>
    %cst_32 = arith.constant 5.000000e-01 : f32
    %107 = vector.broadcast %cst_32 : f32 to vector<8x128xf32>
    %108 = arith.addf %106, %107 : vector<8x128xf32>
    %109 = arith.select %15, %104, %108 : vector<8x128xi1>, vector<8x128xf32>
    %110 = vector.extract_strided_slice %109 {offsets = [0, 0], sizes = [8, 32], strides = [1, 1]} : vector<8x128xf32> to vector<8x32xf32>
    %111 = vector.extract_strided_slice %109 {offsets = [0, 32], sizes = [8, 32], strides = [1, 1]} : vector<8x128xf32> to vector<8x32xf32>
    %112 = vector.extract_strided_slice %109 {offsets = [0, 64], sizes = [8, 32], strides = [1, 1]} : vector<8x128xf32> to vector<8x32xf32>
    %113 = vector.extract_strided_slice %109 {offsets = [0, 96], sizes = [8, 32], strides = [1, 1]} : vector<8x128xf32> to vector<8x32xf32>
    %114 = arith.mulf %111, %76 : vector<8x32xf32>
    %115 = arith.mulf %110, %112 : vector<8x32xf32>
    %116 = arith.addf %114, %115 : vector<8x32xf32>
    %117 = math.tanh %116 : vector<8x32xf32>
    %118 = arith.mulf %113, %117 : vector<8x32xf32>
    %cst_33 = arith.constant dense<0.000000e+00> : vector<8x128xf32>
    %119 = tpu.matmul %118, %1, %cst_33 {dimension_numbers = #tpu.dot_dimension_numbers<[1], [0], [0], [1], [0, 0, 1, 1], [], []>} : vector<8x32xf32>, vector<32x128xf32>, vector<8x128xf32> -> vector<8x128xf32>
    %cst_34 = arith.constant dense<0.000000e+00> : vector<8x128xf32>
    %120 = tpu.matmul %99, %2, %cst_34 {dimension_numbers = #tpu.dot_dimension_numbers<[1], [0], [0], [1], [0, 0, 1, 1], [], []>} : vector<8x32xf32>, vector<32x128xf32>, vector<8x128xf32> -> vector<8x128xf32>
    %121 = arith.addf %119, %120 : vector<8x128xf32>
    %122 = vector.broadcast %3 : vector<1x128xf32> to vector<8x128xf32>
    %123 = arith.addf %121, %122 : vector<8x128xf32>
    %124 = arith.mulf %123, %18 : vector<8x128xf32>
    %125 = math.tanh %124 : vector<8x128xf32>
    %cst_35 = arith.constant 5.000000e-01 : f32
    %126 = vector.broadcast %cst_35 : f32 to vector<8x128xf32>
    %127 = arith.mulf %126, %125 : vector<8x128xf32>
    %cst_36 = arith.constant 5.000000e-01 : f32
    %128 = vector.broadcast %cst_36 : f32 to vector<8x128xf32>
    %129 = arith.addf %127, %128 : vector<8x128xf32>
    %130 = arith.select %15, %125, %129 : vector<8x128xi1>, vector<8x128xf32>
    %131 = vector.extract_strided_slice %130 {offsets = [0, 0], sizes = [8, 32], strides = [1, 1]} : vector<8x128xf32> to vector<8x32xf32>
    %132 = vector.extract_strided_slice %130 {offsets = [0, 32], sizes = [8, 32], strides = [1, 1]} : vector<8x128xf32> to vector<8x32xf32>
    %133 = vector.extract_strided_slice %130 {offsets = [0, 64], sizes = [8, 32], strides = [1, 1]} : vector<8x128xf32> to vector<8x32xf32>
    %134 = vector.extract_strided_slice %130 {offsets = [0, 96], sizes = [8, 32], strides = [1, 1]} : vector<8x128xf32> to vector<8x32xf32>
    %135 = arith.mulf %132, %97 : vector<8x32xf32>
    %136 = arith.mulf %131, %133 : vector<8x32xf32>
    %137 = arith.addf %135, %136 : vector<8x32xf32>
    %138 = math.tanh %137 : vector<8x32xf32>
    %139 = arith.mulf %134, %138 : vector<8x32xf32>
    %140 = vector.extract_strided_slice %9 {offsets = [24, 0], sizes = [8, 128], strides = [1, 1]} : vector<64x128xf32> to vector<8x128xf32>
    %cst_37 = arith.constant dense<0.000000e+00> : vector<8x128xf32>
    %141 = tpu.matmul %118, %0, %cst_37 {dimension_numbers = #tpu.dot_dimension_numbers<[1], [0], [0], [1], [0, 0, 1, 1], [], []>} : vector<8x32xf32>, vector<32x128xf32>, vector<8x128xf32> -> vector<8x128xf32>
    %142 = arith.addf %140, %141 : vector<8x128xf32>
    %143 = arith.mulf %142, %18 : vector<8x128xf32>
    %144 = math.tanh %143 : vector<8x128xf32>
    %cst_38 = arith.constant 5.000000e-01 : f32
    %145 = vector.broadcast %cst_38 : f32 to vector<8x128xf32>
    %146 = arith.mulf %145, %144 : vector<8x128xf32>
    %cst_39 = arith.constant 5.000000e-01 : f32
    %147 = vector.broadcast %cst_39 : f32 to vector<8x128xf32>
    %148 = arith.addf %146, %147 : vector<8x128xf32>
    %149 = arith.select %15, %144, %148 : vector<8x128xi1>, vector<8x128xf32>
    %150 = vector.extract_strided_slice %149 {offsets = [0, 0], sizes = [8, 32], strides = [1, 1]} : vector<8x128xf32> to vector<8x32xf32>
    %151 = vector.extract_strided_slice %149 {offsets = [0, 32], sizes = [8, 32], strides = [1, 1]} : vector<8x128xf32> to vector<8x32xf32>
    %152 = vector.extract_strided_slice %149 {offsets = [0, 64], sizes = [8, 32], strides = [1, 1]} : vector<8x128xf32> to vector<8x32xf32>
    %153 = vector.extract_strided_slice %149 {offsets = [0, 96], sizes = [8, 32], strides = [1, 1]} : vector<8x128xf32> to vector<8x32xf32>
    %154 = arith.mulf %151, %116 : vector<8x32xf32>
    %155 = arith.mulf %150, %152 : vector<8x32xf32>
    %156 = arith.addf %154, %155 : vector<8x32xf32>
    %157 = math.tanh %156 : vector<8x32xf32>
    %158 = arith.mulf %153, %157 : vector<8x32xf32>
    %cst_40 = arith.constant dense<0.000000e+00> : vector<8x128xf32>
    %159 = tpu.matmul %158, %1, %cst_40 {dimension_numbers = #tpu.dot_dimension_numbers<[1], [0], [0], [1], [0, 0, 1, 1], [], []>} : vector<8x32xf32>, vector<32x128xf32>, vector<8x128xf32> -> vector<8x128xf32>
    %cst_41 = arith.constant dense<0.000000e+00> : vector<8x128xf32>
    %160 = tpu.matmul %139, %2, %cst_41 {dimension_numbers = #tpu.dot_dimension_numbers<[1], [0], [0], [1], [0, 0, 1, 1], [], []>} : vector<8x32xf32>, vector<32x128xf32>, vector<8x128xf32> -> vector<8x128xf32>
    %161 = arith.addf %159, %160 : vector<8x128xf32>
    %162 = vector.broadcast %3 : vector<1x128xf32> to vector<8x128xf32>
    %163 = arith.addf %161, %162 : vector<8x128xf32>
    %164 = arith.mulf %163, %18 : vector<8x128xf32>
    %165 = math.tanh %164 : vector<8x128xf32>
    %cst_42 = arith.constant 5.000000e-01 : f32
    %166 = vector.broadcast %cst_42 : f32 to vector<8x128xf32>
    %167 = arith.mulf %166, %165 : vector<8x128xf32>
    %cst_43 = arith.constant 5.000000e-01 : f32
    %168 = vector.broadcast %cst_43 : f32 to vector<8x128xf32>
    %169 = arith.addf %167, %168 : vector<8x128xf32>
    %170 = arith.select %15, %165, %169 : vector<8x128xi1>, vector<8x128xf32>
    %171 = vector.extract_strided_slice %170 {offsets = [0, 0], sizes = [8, 32], strides = [1, 1]} : vector<8x128xf32> to vector<8x32xf32>
    %172 = vector.extract_strided_slice %170 {offsets = [0, 32], sizes = [8, 32], strides = [1, 1]} : vector<8x128xf32> to vector<8x32xf32>
    %173 = vector.extract_strided_slice %170 {offsets = [0, 64], sizes = [8, 32], strides = [1, 1]} : vector<8x128xf32> to vector<8x32xf32>
    %174 = vector.extract_strided_slice %170 {offsets = [0, 96], sizes = [8, 32], strides = [1, 1]} : vector<8x128xf32> to vector<8x32xf32>
    %175 = arith.mulf %172, %137 : vector<8x32xf32>
    %176 = arith.mulf %171, %173 : vector<8x32xf32>
    %177 = arith.addf %175, %176 : vector<8x32xf32>
    %178 = math.tanh %177 : vector<8x32xf32>
    %179 = arith.mulf %174, %178 : vector<8x32xf32>
    %180 = vector.extract_strided_slice %9 {offsets = [32, 0], sizes = [8, 128], strides = [1, 1]} : vector<64x128xf32> to vector<8x128xf32>
    %cst_44 = arith.constant dense<0.000000e+00> : vector<8x128xf32>
    %181 = tpu.matmul %158, %0, %cst_44 {dimension_numbers = #tpu.dot_dimension_numbers<[1], [0], [0], [1], [0, 0, 1, 1], [], []>} : vector<8x32xf32>, vector<32x128xf32>, vector<8x128xf32> -> vector<8x128xf32>
    %182 = arith.addf %180, %181 : vector<8x128xf32>
    %183 = arith.mulf %182, %18 : vector<8x128xf32>
    %184 = math.tanh %183 : vector<8x128xf32>
    %cst_45 = arith.constant 5.000000e-01 : f32
    %185 = vector.broadcast %cst_45 : f32 to vector<8x128xf32>
    %186 = arith.mulf %185, %184 : vector<8x128xf32>
    %cst_46 = arith.constant 5.000000e-01 : f32
    %187 = vector.broadcast %cst_46 : f32 to vector<8x128xf32>
    %188 = arith.addf %186, %187 : vector<8x128xf32>
    %189 = arith.select %15, %184, %188 : vector<8x128xi1>, vector<8x128xf32>
    %190 = vector.extract_strided_slice %189 {offsets = [0, 0], sizes = [8, 32], strides = [1, 1]} : vector<8x128xf32> to vector<8x32xf32>
    %191 = vector.extract_strided_slice %189 {offsets = [0, 32], sizes = [8, 32], strides = [1, 1]} : vector<8x128xf32> to vector<8x32xf32>
    %192 = vector.extract_strided_slice %189 {offsets = [0, 64], sizes = [8, 32], strides = [1, 1]} : vector<8x128xf32> to vector<8x32xf32>
    %193 = vector.extract_strided_slice %189 {offsets = [0, 96], sizes = [8, 32], strides = [1, 1]} : vector<8x128xf32> to vector<8x32xf32>
    %194 = arith.mulf %191, %156 : vector<8x32xf32>
    %195 = arith.mulf %190, %192 : vector<8x32xf32>
    %196 = arith.addf %194, %195 : vector<8x32xf32>
    %197 = math.tanh %196 : vector<8x32xf32>
    %198 = arith.mulf %193, %197 : vector<8x32xf32>
    %cst_47 = arith.constant dense<0.000000e+00> : vector<8x128xf32>
    %199 = tpu.matmul %198, %1, %cst_47 {dimension_numbers = #tpu.dot_dimension_numbers<[1], [0], [0], [1], [0, 0, 1, 1], [], []>} : vector<8x32xf32>, vector<32x128xf32>, vector<8x128xf32> -> vector<8x128xf32>
    %cst_48 = arith.constant dense<0.000000e+00> : vector<8x128xf32>
    %200 = tpu.matmul %179, %2, %cst_48 {dimension_numbers = #tpu.dot_dimension_numbers<[1], [0], [0], [1], [0, 0, 1, 1], [], []>} : vector<8x32xf32>, vector<32x128xf32>, vector<8x128xf32> -> vector<8x128xf32>
    %201 = arith.addf %199, %200 : vector<8x128xf32>
    %202 = vector.broadcast %3 : vector<1x128xf32> to vector<8x128xf32>
    %203 = arith.addf %201, %202 : vector<8x128xf32>
    %204 = arith.mulf %203, %18 : vector<8x128xf32>
    %205 = math.tanh %204 : vector<8x128xf32>
    %cst_49 = arith.constant 5.000000e-01 : f32
    %206 = vector.broadcast %cst_49 : f32 to vector<8x128xf32>
    %207 = arith.mulf %206, %205 : vector<8x128xf32>
    %cst_50 = arith.constant 5.000000e-01 : f32
    %208 = vector.broadcast %cst_50 : f32 to vector<8x128xf32>
    %209 = arith.addf %207, %208 : vector<8x128xf32>
    %210 = arith.select %15, %205, %209 : vector<8x128xi1>, vector<8x128xf32>
    %211 = vector.extract_strided_slice %210 {offsets = [0, 0], sizes = [8, 32], strides = [1, 1]} : vector<8x128xf32> to vector<8x32xf32>
    %212 = vector.extract_strided_slice %210 {offsets = [0, 32], sizes = [8, 32], strides = [1, 1]} : vector<8x128xf32> to vector<8x32xf32>
    %213 = vector.extract_strided_slice %210 {offsets = [0, 64], sizes = [8, 32], strides = [1, 1]} : vector<8x128xf32> to vector<8x32xf32>
    %214 = vector.extract_strided_slice %210 {offsets = [0, 96], sizes = [8, 32], strides = [1, 1]} : vector<8x128xf32> to vector<8x32xf32>
    %215 = arith.mulf %212, %177 : vector<8x32xf32>
    %216 = arith.mulf %211, %213 : vector<8x32xf32>
    %217 = arith.addf %215, %216 : vector<8x32xf32>
    %218 = math.tanh %217 : vector<8x32xf32>
    %219 = arith.mulf %214, %218 : vector<8x32xf32>
    %220 = vector.extract_strided_slice %9 {offsets = [40, 0], sizes = [8, 128], strides = [1, 1]} : vector<64x128xf32> to vector<8x128xf32>
    %cst_51 = arith.constant dense<0.000000e+00> : vector<8x128xf32>
    %221 = tpu.matmul %198, %0, %cst_51 {dimension_numbers = #tpu.dot_dimension_numbers<[1], [0], [0], [1], [0, 0, 1, 1], [], []>} : vector<8x32xf32>, vector<32x128xf32>, vector<8x128xf32> -> vector<8x128xf32>
    %222 = arith.addf %220, %221 : vector<8x128xf32>
    %223 = arith.mulf %222, %18 : vector<8x128xf32>
    %224 = math.tanh %223 : vector<8x128xf32>
    %cst_52 = arith.constant 5.000000e-01 : f32
    %225 = vector.broadcast %cst_52 : f32 to vector<8x128xf32>
    %226 = arith.mulf %225, %224 : vector<8x128xf32>
    %cst_53 = arith.constant 5.000000e-01 : f32
    %227 = vector.broadcast %cst_53 : f32 to vector<8x128xf32>
    %228 = arith.addf %226, %227 : vector<8x128xf32>
    %229 = arith.select %15, %224, %228 : vector<8x128xi1>, vector<8x128xf32>
    %230 = vector.extract_strided_slice %229 {offsets = [0, 0], sizes = [8, 32], strides = [1, 1]} : vector<8x128xf32> to vector<8x32xf32>
    %231 = vector.extract_strided_slice %229 {offsets = [0, 32], sizes = [8, 32], strides = [1, 1]} : vector<8x128xf32> to vector<8x32xf32>
    %232 = vector.extract_strided_slice %229 {offsets = [0, 64], sizes = [8, 32], strides = [1, 1]} : vector<8x128xf32> to vector<8x32xf32>
    %233 = vector.extract_strided_slice %229 {offsets = [0, 96], sizes = [8, 32], strides = [1, 1]} : vector<8x128xf32> to vector<8x32xf32>
    %234 = arith.mulf %231, %196 : vector<8x32xf32>
    %235 = arith.mulf %230, %232 : vector<8x32xf32>
    %236 = arith.addf %234, %235 : vector<8x32xf32>
    %237 = math.tanh %236 : vector<8x32xf32>
    %238 = arith.mulf %233, %237 : vector<8x32xf32>
    %cst_54 = arith.constant dense<0.000000e+00> : vector<8x128xf32>
    %239 = tpu.matmul %238, %1, %cst_54 {dimension_numbers = #tpu.dot_dimension_numbers<[1], [0], [0], [1], [0, 0, 1, 1], [], []>} : vector<8x32xf32>, vector<32x128xf32>, vector<8x128xf32> -> vector<8x128xf32>
    %cst_55 = arith.constant dense<0.000000e+00> : vector<8x128xf32>
    %240 = tpu.matmul %219, %2, %cst_55 {dimension_numbers = #tpu.dot_dimension_numbers<[1], [0], [0], [1], [0, 0, 1, 1], [], []>} : vector<8x32xf32>, vector<32x128xf32>, vector<8x128xf32> -> vector<8x128xf32>
    %241 = arith.addf %239, %240 : vector<8x128xf32>
    %242 = vector.broadcast %3 : vector<1x128xf32> to vector<8x128xf32>
    %243 = arith.addf %241, %242 : vector<8x128xf32>
    %244 = arith.mulf %243, %18 : vector<8x128xf32>
    %245 = math.tanh %244 : vector<8x128xf32>
    %cst_56 = arith.constant 5.000000e-01 : f32
    %246 = vector.broadcast %cst_56 : f32 to vector<8x128xf32>
    %247 = arith.mulf %246, %245 : vector<8x128xf32>
    %cst_57 = arith.constant 5.000000e-01 : f32
    %248 = vector.broadcast %cst_57 : f32 to vector<8x128xf32>
    %249 = arith.addf %247, %248 : vector<8x128xf32>
    %250 = arith.select %15, %245, %249 : vector<8x128xi1>, vector<8x128xf32>
    %251 = vector.extract_strided_slice %250 {offsets = [0, 0], sizes = [8, 32], strides = [1, 1]} : vector<8x128xf32> to vector<8x32xf32>
    %252 = vector.extract_strided_slice %250 {offsets = [0, 32], sizes = [8, 32], strides = [1, 1]} : vector<8x128xf32> to vector<8x32xf32>
    %253 = vector.extract_strided_slice %250 {offsets = [0, 64], sizes = [8, 32], strides = [1, 1]} : vector<8x128xf32> to vector<8x32xf32>
    %254 = vector.extract_strided_slice %250 {offsets = [0, 96], sizes = [8, 32], strides = [1, 1]} : vector<8x128xf32> to vector<8x32xf32>
    %255 = arith.mulf %252, %217 : vector<8x32xf32>
    %256 = arith.mulf %251, %253 : vector<8x32xf32>
    %257 = arith.addf %255, %256 : vector<8x32xf32>
    %258 = math.tanh %257 : vector<8x32xf32>
    %259 = arith.mulf %254, %258 : vector<8x32xf32>
    %260 = vector.extract_strided_slice %9 {offsets = [48, 0], sizes = [8, 128], strides = [1, 1]} : vector<64x128xf32> to vector<8x128xf32>
    %cst_58 = arith.constant dense<0.000000e+00> : vector<8x128xf32>
    %261 = tpu.matmul %238, %0, %cst_58 {dimension_numbers = #tpu.dot_dimension_numbers<[1], [0], [0], [1], [0, 0, 1, 1], [], []>} : vector<8x32xf32>, vector<32x128xf32>, vector<8x128xf32> -> vector<8x128xf32>
    %262 = arith.addf %260, %261 : vector<8x128xf32>
    %263 = arith.mulf %262, %18 : vector<8x128xf32>
    %264 = math.tanh %263 : vector<8x128xf32>
    %cst_59 = arith.constant 5.000000e-01 : f32
    %265 = vector.broadcast %cst_59 : f32 to vector<8x128xf32>
    %266 = arith.mulf %265, %264 : vector<8x128xf32>
    %cst_60 = arith.constant 5.000000e-01 : f32
    %267 = vector.broadcast %cst_60 : f32 to vector<8x128xf32>
    %268 = arith.addf %266, %267 : vector<8x128xf32>
    %269 = arith.select %15, %264, %268 : vector<8x128xi1>, vector<8x128xf32>
    %270 = vector.extract_strided_slice %269 {offsets = [0, 0], sizes = [8, 32], strides = [1, 1]} : vector<8x128xf32> to vector<8x32xf32>
    %271 = vector.extract_strided_slice %269 {offsets = [0, 32], sizes = [8, 32], strides = [1, 1]} : vector<8x128xf32> to vector<8x32xf32>
    %272 = vector.extract_strided_slice %269 {offsets = [0, 64], sizes = [8, 32], strides = [1, 1]} : vector<8x128xf32> to vector<8x32xf32>
    %273 = vector.extract_strided_slice %269 {offsets = [0, 96], sizes = [8, 32], strides = [1, 1]} : vector<8x128xf32> to vector<8x32xf32>
    %274 = arith.mulf %271, %236 : vector<8x32xf32>
    %275 = arith.mulf %270, %272 : vector<8x32xf32>
    %276 = arith.addf %274, %275 : vector<8x32xf32>
    %277 = math.tanh %276 : vector<8x32xf32>
    %278 = arith.mulf %273, %277 : vector<8x32xf32>
    %cst_61 = arith.constant dense<0.000000e+00> : vector<8x128xf32>
    %279 = tpu.matmul %278, %1, %cst_61 {dimension_numbers = #tpu.dot_dimension_numbers<[1], [0], [0], [1], [0, 0, 1, 1], [], []>} : vector<8x32xf32>, vector<32x128xf32>, vector<8x128xf32> -> vector<8x128xf32>
    %cst_62 = arith.constant dense<0.000000e+00> : vector<8x128xf32>
    %280 = tpu.matmul %259, %2, %cst_62 {dimension_numbers = #tpu.dot_dimension_numbers<[1], [0], [0], [1], [0, 0, 1, 1], [], []>} : vector<8x32xf32>, vector<32x128xf32>, vector<8x128xf32> -> vector<8x128xf32>
    %281 = arith.addf %279, %280 : vector<8x128xf32>
    %282 = vector.broadcast %3 : vector<1x128xf32> to vector<8x128xf32>
    %283 = arith.addf %281, %282 : vector<8x128xf32>
    %284 = arith.mulf %283, %18 : vector<8x128xf32>
    %285 = math.tanh %284 : vector<8x128xf32>
    %cst_63 = arith.constant 5.000000e-01 : f32
    %286 = vector.broadcast %cst_63 : f32 to vector<8x128xf32>
    %287 = arith.mulf %286, %285 : vector<8x128xf32>
    %cst_64 = arith.constant 5.000000e-01 : f32
    %288 = vector.broadcast %cst_64 : f32 to vector<8x128xf32>
    %289 = arith.addf %287, %288 : vector<8x128xf32>
    %290 = arith.select %15, %285, %289 : vector<8x128xi1>, vector<8x128xf32>
    %291 = vector.extract_strided_slice %290 {offsets = [0, 0], sizes = [8, 32], strides = [1, 1]} : vector<8x128xf32> to vector<8x32xf32>
    %292 = vector.extract_strided_slice %290 {offsets = [0, 32], sizes = [8, 32], strides = [1, 1]} : vector<8x128xf32> to vector<8x32xf32>
    %293 = vector.extract_strided_slice %290 {offsets = [0, 64], sizes = [8, 32], strides = [1, 1]} : vector<8x128xf32> to vector<8x32xf32>
    %294 = vector.extract_strided_slice %290 {offsets = [0, 96], sizes = [8, 32], strides = [1, 1]} : vector<8x128xf32> to vector<8x32xf32>
    %295 = arith.mulf %292, %257 : vector<8x32xf32>
    %296 = arith.mulf %291, %293 : vector<8x32xf32>
    %297 = arith.addf %295, %296 : vector<8x32xf32>
    %298 = math.tanh %297 : vector<8x32xf32>
    %299 = arith.mulf %294, %298 : vector<8x32xf32>
    %300 = vector.extract_strided_slice %9 {offsets = [56, 0], sizes = [8, 128], strides = [1, 1]} : vector<64x128xf32> to vector<8x128xf32>
    %cst_65 = arith.constant dense<0.000000e+00> : vector<8x128xf32>
    %301 = tpu.matmul %278, %0, %cst_65 {dimension_numbers = #tpu.dot_dimension_numbers<[1], [0], [0], [1], [0, 0, 1, 1], [], []>} : vector<8x32xf32>, vector<32x128xf32>, vector<8x128xf32> -> vector<8x128xf32>
    %302 = arith.addf %300, %301 : vector<8x128xf32>
    %303 = arith.mulf %302, %18 : vector<8x128xf32>
    %304 = math.tanh %303 : vector<8x128xf32>
    %cst_66 = arith.constant 5.000000e-01 : f32
    %305 = vector.broadcast %cst_66 : f32 to vector<8x128xf32>
    %306 = arith.mulf %305, %304 : vector<8x128xf32>
    %cst_67 = arith.constant 5.000000e-01 : f32
    %307 = vector.broadcast %cst_67 : f32 to vector<8x128xf32>
    %308 = arith.addf %306, %307 : vector<8x128xf32>
    %309 = arith.select %15, %304, %308 : vector<8x128xi1>, vector<8x128xf32>
    %310 = vector.extract_strided_slice %309 {offsets = [0, 0], sizes = [8, 32], strides = [1, 1]} : vector<8x128xf32> to vector<8x32xf32>
    %311 = vector.extract_strided_slice %309 {offsets = [0, 32], sizes = [8, 32], strides = [1, 1]} : vector<8x128xf32> to vector<8x32xf32>
    %312 = vector.extract_strided_slice %309 {offsets = [0, 64], sizes = [8, 32], strides = [1, 1]} : vector<8x128xf32> to vector<8x32xf32>
    %313 = vector.extract_strided_slice %309 {offsets = [0, 96], sizes = [8, 32], strides = [1, 1]} : vector<8x128xf32> to vector<8x32xf32>
    %314 = arith.mulf %311, %276 : vector<8x32xf32>
    %315 = arith.mulf %310, %312 : vector<8x32xf32>
    %316 = arith.addf %314, %315 : vector<8x32xf32>
    %317 = math.tanh %316 : vector<8x32xf32>
    %318 = arith.mulf %313, %317 : vector<8x32xf32>
    %cst_68 = arith.constant dense<0.000000e+00> : vector<8x128xf32>
    %319 = tpu.matmul %318, %1, %cst_68 {dimension_numbers = #tpu.dot_dimension_numbers<[1], [0], [0], [1], [0, 0, 1, 1], [], []>} : vector<8x32xf32>, vector<32x128xf32>, vector<8x128xf32> -> vector<8x128xf32>
    %cst_69 = arith.constant dense<0.000000e+00> : vector<8x128xf32>
    %320 = tpu.matmul %299, %2, %cst_69 {dimension_numbers = #tpu.dot_dimension_numbers<[1], [0], [0], [1], [0, 0, 1, 1], [], []>} : vector<8x32xf32>, vector<32x128xf32>, vector<8x128xf32> -> vector<8x128xf32>
    %321 = arith.addf %319, %320 : vector<8x128xf32>
    %322 = vector.broadcast %3 : vector<1x128xf32> to vector<8x128xf32>
    %323 = arith.addf %321, %322 : vector<8x128xf32>
    %324 = arith.mulf %323, %18 : vector<8x128xf32>
    %325 = math.tanh %324 : vector<8x128xf32>
    %cst_70 = arith.constant 5.000000e-01 : f32
    %326 = vector.broadcast %cst_70 : f32 to vector<8x128xf32>
    %327 = arith.mulf %326, %325 : vector<8x128xf32>
    %cst_71 = arith.constant 5.000000e-01 : f32
    %328 = vector.broadcast %cst_71 : f32 to vector<8x128xf32>
    %329 = arith.addf %327, %328 : vector<8x128xf32>
    %330 = arith.select %15, %325, %329 : vector<8x128xi1>, vector<8x128xf32>
    %331 = vector.extract_strided_slice %330 {offsets = [0, 0], sizes = [8, 32], strides = [1, 1]} : vector<8x128xf32> to vector<8x32xf32>
    %332 = vector.extract_strided_slice %330 {offsets = [0, 32], sizes = [8, 32], strides = [1, 1]} : vector<8x128xf32> to vector<8x32xf32>
    %333 = vector.extract_strided_slice %330 {offsets = [0, 64], sizes = [8, 32], strides = [1, 1]} : vector<8x128xf32> to vector<8x32xf32>
    %334 = vector.extract_strided_slice %330 {offsets = [0, 96], sizes = [8, 32], strides = [1, 1]} : vector<8x128xf32> to vector<8x32xf32>
    %335 = arith.mulf %332, %297 : vector<8x32xf32>
    %336 = arith.mulf %331, %333 : vector<8x32xf32>
    %337 = arith.addf %335, %336 : vector<8x32xf32>
    %338 = math.tanh %337 : vector<8x32xf32>
    %339 = arith.mulf %334, %338 : vector<8x32xf32>
    %c0_72 = arith.constant 0 : index
    %c0_73 = arith.constant 0 : index
    %340 = vector.load %arg7[%c0_72, %c0_73] : memref<32x32xf32, #tpu.memory_space<vmem>>, vector<32x32xf32>
    %cst_74 = arith.constant dense<0.000000e+00> : vector<8x32xf32>
    %341 = tpu.matmul %339, %340, %cst_74 {dimension_numbers = #tpu.dot_dimension_numbers<[1], [0], [0], [1], [0, 0, 1, 1], [], []>} : vector<8x32xf32>, vector<32x32xf32>, vector<8x32xf32> -> vector<8x32xf32>
    %c0_75 = arith.constant 0 : index
    %c0_76 = arith.constant 0 : index
    %342 = vector.load %arg8[%c0_75, %c0_76] : memref<1x32xf32, #tpu.memory_space<vmem>>, vector<1x32xf32>
    %343 = vector.broadcast %342 : vector<1x32xf32> to vector<8x32xf32>
    %344 = arith.addf %341, %343 : vector<8x32xf32>
    %cst_77 = arith.constant 0.000000e+00 : f32
    %345 = vector.broadcast %cst_77 : f32 to vector<8x32xf32>
    %346 = arith.maximumf %344, %345 : vector<8x32xf32>
    %c0_78 = arith.constant 0 : index
    %c0_79 = arith.constant 0 : index
    %347 = vector.load %arg9[%c0_78, %c0_79] : memref<32x8xf32, #tpu.memory_space<vmem>>, vector<32x8xf32>
    %cst_80 = arith.constant dense<0.000000e+00> : vector<8x8xf32>
    %348 = tpu.matmul %346, %347, %cst_80 {dimension_numbers = #tpu.dot_dimension_numbers<[1], [0], [0], [1], [0, 0, 1, 1], [], []>} : vector<8x32xf32>, vector<32x8xf32>, vector<8x8xf32> -> vector<8x8xf32>
    %c0_81 = arith.constant 0 : index
    %c0_82 = arith.constant 0 : index
    %349 = vector.load %arg10[%c0_81, %c0_82] : memref<1x8xf32, #tpu.memory_space<vmem>>, vector<1x8xf32>
    %350 = vector.broadcast %349 : vector<1x8xf32> to vector<8x8xf32>
    %351 = arith.addf %348, %350 : vector<8x8xf32>
    %cst_83 = arith.constant dense<0xFF800000> : vector<8xf32>
    %352 = vector.multi_reduction <maximumf>, %351, %cst_83 [1] : vector<8x8xf32> to vector<8xf32>
    %353 = vector.shape_cast %352 : vector<8xf32> to vector<8x1xf32>
    %354 = vector.broadcast %353 : vector<8x1xf32> to vector<8x8xf32>
    %355 = arith.subf %351, %354 : vector<8x8xf32>
    %356 = math.exp %355 : vector<8x8xf32>
    %cst_84 = arith.constant dense<0.000000e+00> : vector<8xf32>
    %357 = vector.multi_reduction <add>, %356, %cst_84 [1] : vector<8x8xf32> to vector<8xf32>
    %358 = vector.shape_cast %357 : vector<8xf32> to vector<8x1xf32>
    %359 = math.log %358 : vector<8x1xf32>
    %360 = vector.broadcast %359 : vector<8x1xf32> to vector<8x8xf32>
    %361 = arith.subf %355, %360 : vector<8x8xf32>
    %c0_85 = arith.constant 0 : index
    %c0_86 = arith.constant 0 : index
    %362 = vector.load %arg11[%c0_85, %c0_86] : memref<8x8xf32, #tpu.memory_space<vmem>>, vector<8x8xf32>
    tpu.vector_store %arg11[%c0_85, %c0_86], %361 {strides = array<i32>} : memref<8x8xf32, #tpu.memory_space<vmem>>, vector<8x8xf32>,
    return
  }
}

</mosaic_0001>

<bundles_post_ra>
// kernel: wistar_forward.1
= control target key start
LH: loop header
LB: loop body
LE: loop exit
PB: predicated region body
PF: predicated region fallthrough
CT: control target
= control target key end

     0   :  { %vm69_vm0 = vcmask 130048   ;;  %v3274_v3 = vmov 0.0|0.0   ;;  %vm3275_vm1 = vmmov 0   ;;  %v3276_v10 = vmov 0.0   ;;  %s3865_s0 = inlined_call_operand.vmem [shape: f32[64,16], index: 0, kind: input, shape index: {}]   ;;  %s3866_s1 = inlined_call_operand.vmem [shape: f32[16,128], index: 1, kind: input, shape index: {}]   ;;  %s3867_s2 = inlined_call_operand.vmem [shape: f32[32,128], index: 2, kind: input, shape index: {}]   ;;  %s3868_s3 = inlined_call_operand.vmem [shape: f32[1,128], index: 3, kind: input, shape index: {}]   ;;  %s3869_s4 = inlined_call_operand.vmem [shape: f32[32,128], index: 4, kind: input, shape index: {}]   ;;  %s3870_s5 = inlined_call_operand.vmem [shape: f32[32,128], index: 5, kind: input, shape index: {}]   ;;  %s3871_s6 = inlined_call_operand.vmem [shape: f32[1,128], index: 6, kind: input, shape index: {}]   ;;  %s3872_s7 = inlined_call_operand.vmem [shape: f32[32,32], index: 7, kind: input, shape index: {}]   ;;  %s3873_s8 = inlined_call_operand.vmem [shape: f32[1,32], index: 8, kind: input, shape index: {}]   ;;  %s3874_s9 = inlined_call_operand.vmem [shape: f32[32,8], index: 9, kind: input, shape index: {}]   ;;  %s3875_s10 = inlined_call_operand.vmem [shape: f32[1,8], index: 10, kind: input, shape index: {}]   ;;  %s3876_s11 = inlined_call_operand.hbm [shape: f32[8,8], index: 11, kind: output, shape index: {}]  }
   0x1   :  { %v60_v0 = vld [vmem:[%s3866_s1] sm:$0xff]  ;;  %v61_v1 = vld [vmem:[%s3866_s1 + $0x8] sm:$0xff]  ;;  %3019 = vmatprep.subr.bf16.mxu1 %v3274_v3  ;;  %v41_v8 = vld [vmem:[%s3867_s2 + $0x10] sm:$0xff]  ;;  %2737 = vmatprep.mubr.msk.f32.mxu1 %vm3275_vm1, %v3276_v10 }
   0x2   :  { %v39_v2 = vld [vmem:[%s3867_s2] sm:$0xff]  ;;  %v3015_v4 = vpack.c.bf16 %v61_v1, %v60_v0  ;;  %v40_v5 = vld [vmem:[%s3867_s2 + $0x8] sm:$0xff]  ;;  %v42_v9 = vld [vmem:[%s3867_s2 + $0x18] sm:$0xff] }
   0x3   :  { %v52_v6 = vld [vmem:[%s3865_s0] sm:$0xff]  ;;  %v3357_v7 = vpack.c.bf16 %v40_v5, %v39_v2 }
   0x4   :  { %2717 = vmatprep.mubr.msk.f32.mxu0 %vm69_vm0, %v52_v6 }
   0x5   :  { %16 = vsyncpa [#allocation3], 0  ;;  %3016 = vmatprep.subr.bf16.mxu0 %v3015_v4  ;;  %3021 = vmatpush3.bf16.msra.mxu1 %v3357_v7  ;;  %v53_v11 = vld [vmem:[%s3865_s0 + $0x8] sm:$0xff]  ;;  %v3372_v12 = vpack.c.bf16 %v42_v9, %v41_v8  ;;  %v199_v13 = vlaneseq  ;;  %v3385_v15 = vld [vmem:[%s3868_s3] ss:$0 sm:$0xff]  ;;  %v3277_v20 = vmov 0.5  }
   0x6   :  { %3018 = vmatpush3.bf16.msra.mxu0 %v3015_v4  ;;  %3022 = vmatprep.subr.bf16.mxu1 %v3274_v3  ;;  %s3278_s3 = smov 64   ;;  %s3279_s14 = smov 32   ;;  %v43_v35 = vld [vmem:[%s3869_s4] sm:$0xff]  ;;  %v44_v36 = vld [vmem:[%s3869_s4 + $0x8] sm:$0xff]  ;;  %v54_v40 = vld [vmem:[%s3865_s0 + $0x10] sm:$0xff]  ;;  %vm205_vm5 = vcmask 261120  }
   0x7   :  { %3031 = vmatprep.subr.bf16.mxu0 %v3274_v3  ;;  %v200_v14 = vand.u32 127, %v199_v13  ;;  %v47_v37 = vld [vmem:[%s3870_s5] sm:$0xff]  ;;  %v3415_v38 = vpack.c.bf16 %v44_v36, %v43_v35  ;;  %v48_v39 = vld [vmem:[%s3870_s5 + $0x8] sm:$0xff]  ;;  %v55_v41 = vld [vmem:[%s3865_s0 + $0x18] sm:$0xff]  ;;  %vm2509_vm6 = vcmask 64512  }
   0x8   :  { %v3426_v42 = vpack.c.bf16 %v48_v39, %v47_v37  ;;  %v49_v43 = vld [vmem:[%s3870_s5 + $0x10] sm:$0xff]  ;;  %v50_v44 = vld [vmem:[%s3870_s5 + $0x18] sm:$0xff]  ;;  %v56_v45 = vld [vmem:[%s3865_s0 + $0x20] sm:$0xff] }
   0x9   :  { %2718 = vmatmul.mubr.msk.f32.vlgmr.msra.gmra.mrb[0].mxu0 %vm69_vm0, %v53_v11  ;;  %3024 = vmatpush3.bf16.msra.mxu1 %v3372_v12  ;;  %vm201_vm2 = vcmp.ge.s32.totalorder %v200_v14, 64  ;;  %vm202_vm3 = vcmp.lt.s32.totalorder %v200_v14, 96  ;;  %v45_v46 = vld [vmem:[%s3869_s4 + $0x10] sm:$0xff]  ;;  %v46_v47 = vld [vmem:[%s3869_s4 + $0x18] sm:$0xff]  ;;  %v3447_v48 = vpack.c.bf16 %v50_v44, %v49_v43  ;;  %v57_v50 = vld [vmem:[%s3865_s0 + $0x28] sm:$0xff] }
   0xa   :  { %3025 = vmatprep.subr.bf16.mxu1 %v3274_v3  ;;  %vm3389_vm4 = vmand %vm201_vm2, %vm202_vm3  ;;  %2720 = vmatprep.mubr.msk.f32.mxu0 %vm69_vm0, %v54_v40  ;;  %v3449_v49 = vpack.c.bf16 %v46_v47, %v45_v46  ;;  %v58_v51 = vld [vmem:[%s3865_s0 + $0x30] sm:$0xff]  ;;  %v59_v52 = vld [vmem:[%s3865_s0 + $0x38] sm:$0xff] }
   0xb   :  { %v3396_v21 = vsel %vm3389_vm4, 1.0, %v3277_v20  ;;  %3033 = vmatpush3.bf16.msra.mxu0 %v3415_v38  ;;  %v3512_v2 = vld [vmem:[%s3871_s6] ss:$0 sm:$0xff]  ;;  %v2340_v18 = vld [vmem:[%s3872_s7 + $0x10] sm:$0xff] }
   0xc   :  { %2738 = vmatmul.mubr.f32.vlgmr.msra.gmra.mrb[0].mxu1 %v3276_v10  ;;  %3034 = vmatprep.subr.bf16.mxu0 %v3274_v3 }
   0xd   :  { %2748 = vmatprep.mubr.msk.f32.mxu1 %vm3275_vm1, %v3276_v10  ;;  %3027 = vmatpush3.bf16.msra.mxu1 %v3426_v42 }
   0xe   :  { %2721 = vmatmul.mubr.msk.f32.gmra.mrb[2].mxu0 %vm69_vm0, %v55_v41  ;;  %3028 = vmatprep.subr.bf16.mxu1 %v3274_v3 }
   0xf   :  { %2723 = vmatprep.mubr.msk.f32.mxu0 %vm69_vm0, %v56_v45  ;;  %3036 = vmatpush3.bf16.msra.mxu0 %v3449_v49 }
  0x10   :  { %3043 = vmatprep.subr.bf16.mxu0 %v3274_v3 }
  0x11   :  { %3030 = vmatpush3.bf16.msra.mxu1 %v3447_v48 }
  0x12   :  { %2724 = vmatmul.mubr.msk.f32.gmra.mrb[4].mxu0 %vm69_vm0, %v57_v50  ;;  %3037 = vmatprep.subr.bf16.mxu1 %v3274_v3 }
  0x13   :  { %2726 = vmatprep.mubr.msk.f32.mxu0 %vm69_vm0, %v58_v51 }
  0x14   :  { %2749 = vmatmul.mubr.f32.vlgmr.msra.gmra.mrb[2].mxu1 %v3276_v10 }
  0x15   :  { %3039 = vmatpush3.bf16.msra.mxu1 %v3357_v7  ;;  %2770 = vmatprep.mubr.msk.f32.mxu1 %vm3275_vm1, %v3276_v10 }
  0x16   :  { %2727 = vmatmul.mubr.msk.f32.gmra.mrb[6].mxu0 %vm69_vm0, %v59_v52  ;;  %3040 = vmatprep.subr.bf16.mxu1 %v3274_v3 }
  0x17   :  { %2759 = vmatprep.mubr.msk.f32.mxu0 %vm3275_vm1, %v3276_v10 }
  0x19   :  { %3042 = vmatpush3.bf16.msra.mxu1 %v3372_v12 }
  0x1a   :  { %3049 = vmatprep.subr.bf16.mxu1 %v3274_v3 }
  0xdc   :  { %v3387_v16 = vpop.f32.mrb[0].mxu0 }
  0xdd   :  { %v160_v17 = vpop.f32.mrb[1].mxu0  ;;  %v166_v1 = vadd.f32 %v3387_v16, %v3385_v15 }
  0xde   :  { %v161_v19 = vadd.f32 %v3385_v15, %v160_v17 }
  0xdf   :  { %v275_v22 = vpop.f32.mrb[0].mxu1 }
  0xe0   :  { %v279_v23 = vadd.f32 %v275_v22, %v161_v19  ;;  %v2739_v24 = vpop.f32.mrb[1].mxu1 }
  0xe1   :  { %v3481_v56 = vpop.f32.mrb[2].mxu0 }
  0xe2   :  { %v280_v25 = vmul.f32 %v279_v23, %v3396_v21  ;;  %v3483_v57 = vpop.f32.mrb[3].mxu0 }
  0xe4   :  { %3182 = vtanh.f32 %v280_v25 }
  0xe5   :  { %v3485_v58 = vpop.f32.mrb[4].mxu0 }
  0xe6   :  { %v3487_v59 = vpop.f32.mrb[5].mxu0 }
  0xe7   :  { %v368_v60 = vpop.f32.mrb[2].mxu1 }
  0xe8   :  { %v2750_v62 = vpop.f32.mrb[3].mxu1 }
  0xe9   :  { %v3489_v61 = vpop.f32.mrb[6].mxu0 }
  0xea   :  { %v3491_v63 = vpop.f32.mrb[7].mxu0 }
  0xee   :  { %v3183_v26 = vpop.eup %3182 }
  0xef   :  { %v282_v27 = vmul.f32 0.5, %v3183_v26 }
  0xf1   :  { %v283_v28 = vadd.f32 0.5, %v282_v27 }
  0xf3   :  { %v284_v29 = vsel %vm3389_vm4, %v3183_v26, %v283_v28 }
  0xf4   :  { %287 = vrot.lane.b32.xlu0 %v284_v29, %s3278_s3  ;;  %v285_v32 = vmul.f32 0.0, %v284_v29 }
 0x166   :  { %v288_v30 = vpop.permute.xlu0 %287 }
 0x167   :  { %v290_v31 = vmul.f32 %v288_v30, %v284_v29 }
 0x169   :  { %292 = vrot.lane.b32.xlu0 %v290_v31, %s3279_s14 }
 0x1db   :  { %v293_v33 = vpop.permute.xlu0 %292 }
 0x1dc   :  { %v3403_v34 = vadd.f32 %v293_v33, %v285_v32 }
 0x1de   :  { %3184 = vtanh.f32 %v3403_v34 }
 0x1e8   :  { %v3185_v53 = vpop.eup %3184 }
 0x1e9   :  { %298 = vrot.lane.b32.xlu1 %v3185_v53, %s3278_s3 }
 0x25b   :  { %v299_v54 = vpop.permute.xlu1 %298 }
 0x25c   :  { %v301_v55 = vmul.f32 %v299_v54, %v284_v29 }
 0x25e   :  { %373 = vrot.lane.b32.xlu1 %v301_v55, %s3279_s14 }
 0x2d0   :  { %v374_v0 = vpop.permute.xlu1 %373 }
 0x2d1   :  { %2760 = vmatmul.mubr.msk.f32.vlgmr.msra.gmra.mrb[8].mxu0 %vm205_vm5, %v374_v0  ;;  %2771 = vmatmul.mubr.msk.f32.vlgmr.msra.gmra.mrb[4].mxu1 %vm205_vm5, %v374_v0 }
 0x2d2   :  { %3051 = vmatpush3.bf16.msra.mxu1 %v3415_v38  ;;  %3045 = vmatpush3.bf16.msra.mxu0 %v3426_v42 }
 0x2d3   :  { %3052 = vmatprep.subr.bf16.mxu1 %v3274_v3  ;;  %3046 = vmatprep.subr.bf16.mxu0 %v3274_v3 }
 0x2d4   :  { %2792 = vmatprep.mubr.msk.f32.mxu1 %vm3275_vm1, %v3276_v10  ;;  %2781 = vmatprep.mubr.msk.f32.mxu0 %vm3275_vm1, %v3276_v10 }
 0x2d6   :  { %3054 = vmatpush3.bf16.msra.mxu1 %v3449_v49  ;;  %3048 = vmatpush3.bf16.msra.mxu0 %v3447_v48 }
 0x2d7   :  { %3055 = vmatprep.subr.bf16.mxu0 %v3274_v3  ;;  %3061 = vmatprep.subr.bf16.mxu1 %v3274_v3 }
 0x3a4   :  { %v443_v4 = vpop.f32.mrb[8].mxu0  ;;  %v542_v5 = vpop.f32.mrb[4].mxu1 }
 0x3a5   :  { %v444_v6 = vadd.f32 %v443_v4, %v368_v60  ;;  %v546_v8 = vadd.f32 %v542_v5, %v166_v1  ;;  %v2761_v9 = vpop.f32.mrb[9].mxu0  ;;  %v2772_v11 = vpop.f32.mrb[5].mxu1  ;;  %v171_v60 = vadd.f32 %v3385_v15, %v3483_v57 }
 0x3a7   :  { %v453_v13 = vadd.f32 %v3512_v2, %v444_v6  ;;  %v547_v14 = vmul.f32 %v546_v8, %v3396_v21 }
 0x3a9   :  { %v454_v17 = vmul.f32 %v453_v13, %v3396_v21  ;;  %3186 = vtanh.f32 %v547_v14 }
 0x3ab   :  { %3188 = vtanh.f32 %v454_v17 }
 0x3b3   :  { %v3187_v16 = vpop.eup %3186 }
 0x3b4   :  { %v549_v19 = vmul.f32 0.5, %v3187_v16 }
 0x3b5   :  { %v3189_v20 = vpop.eup %3188 }
 0x3b6   :  { %v550_v22 = vadd.f32 0.5, %v549_v19  ;;  %v456_v23 = vmul.f32 0.5, %v3189_v20 }
 0x3b8   :  { %v551_v24 = vsel %vm3389_vm4, %v3187_v16, %v550_v22  ;;  %v457_v25 = vadd.f32 0.5, %v456_v23 }
 0x3b9   :  { %554 = vrot.lane.b32.xlu1 %v551_v24, %s3278_s3  ;;  %v552_v31 = vmul.f32 %v551_v24, %v3403_v34 }
 0x3ba   :  { %v458_v26 = vsel %vm3389_vm4, %v3189_v20, %v457_v25 }
 0x3bb   :  { %461 = vrot.lane.b32.xlu0 %v458_v26, %s3278_s3  ;;  %v459_v35 = vmul.f32 0.0, %v458_v26 }
 0x42b   :  { %v555_v27 = vpop.permute.xlu1 %554 }
 0x42c   :  { %v557_v28 = vmul.f32 %v555_v27, %v551_v24 }
 0x42d   :  { %v462_v29 = vpop.permute.xlu0 %461 }
 0x42e   :  { %v464_v30 = vmul.f32 %v462_v29, %v458_v26  ;;  %559 = vrot.lane.b32.xlu1 %v557_v28, %s3279_s14 }
 0x430   :  { %466 = vrot.lane.b32.xlu0 %v464_v30, %s3279_s14 }
 0x4a0   :  { %v560_v32 = vpop.permute.xlu1 %559 }
 0x4a1   :  { %v3526_v33 = vadd.f32 %v560_v32, %v552_v31 }
 0x4a2   :  { %v467_v36 = vpop.permute.xlu0 %466 }
 0x4a3   :  { %3190 = vtanh.f32 %v3526_v33  ;;  %v469_v37 = vadd.f32 %v467_v36, %v459_v35 }
 0x4a5   :  { %3192 = vtanh.f32 %v469_v37 }
 0x4ad   :  { %v3191_v39 = vpop.eup %3190 }
 0x4ae   :  { %565 = vrot.lane.b32.xlu1 %v3191_v39, %s3278_s3 }
 0x4af   :  { %v3193_v40 = vpop.eup %3192 }
 0x4b0   :  { %472 = vrot.lane.b32.xlu0 %v3193_v40, %s3278_s3 }
 0x520   :  { %v566_v41 = vpop.permute.xlu1 %565 }
 0x521   :  { %v568_v43 = vmul.f32 %v566_v41, %v551_v24  ;;  %v176_v41 = vadd.f32 %v3481_v56, %v3385_v15 }
 0x522   :  { %v473_v44 = vpop.permute.xlu0 %472 }
 0x523   :  { %v475_v45 = vmul.f32 %v473_v44, %v458_v26  ;;  %645 = vrot.lane.b32.xlu1 %v568_v43, %s3279_s14 }
 0x525   :  { %570 = vrot.lane.b32.xlu0 %v475_v45, %s3279_s14 }
 0x595   :  { %v646_v34 = vpop.permute.xlu1 %645 }
 0x596   :  { %2793 = vmatmul.mubr.msk.f32.vlgmr.msra.gmra.mrb[6].mxu1 %vm205_vm5, %v646_v34 }
 0x597   :  { %v571_v46 = vpop.permute.xlu0 %570  ;;  %3063 = vmatpush3.bf16.msra.mxu1 %v3426_v42  ;;  %2814 = vmatprep.mubr.msk.f32.mxu1 %vm3275_vm1, %v3276_v10 }
 0x598   :  { %2782 = vmatmul.mubr.msk.f32.vlgmr.msra.gmra.mrb[10].mxu0 %vm205_vm5, %v571_v46  ;;  %3064 = vmatprep.subr.bf16.mxu1 %v3274_v3 }
 0x599   :  { %3057 = vmatpush3.bf16.msra.mxu0 %v3357_v7  ;;  %2803 = vmatprep.mubr.msk.f32.mxu0 %vm3275_vm1, %v3276_v10 }
 0x59a   :  { %3058 = vmatprep.subr.bf16.mxu0 %v3274_v3 }
 0x59b   :  { %3066 = vmatpush3.bf16.msra.mxu1 %v3447_v48 }
 0x59c   :  { %3073 = vmatprep.subr.bf16.mxu1 %v3274_v3 }
 0x59d   :  { %3060 = vmatpush3.bf16.msra.mxu0 %v3372_v12 }
 0x59e   :  { %3067 = vmatprep.subr.bf16.mxu0 %v3274_v3 }
 0x5a0   :  { %2804 = vmatmul.mubr.msk.f32.vlgmr.msra.gmra.mrb[12].mxu0 %vm205_vm5, %v646_v34 }
 0x5a1   :  { %3069 = vmatpush3.bf16.msra.mxu0 %v3415_v38  ;;  %2825 = vmatprep.mubr.msk.f32.mxu0 %vm3275_vm1, %v3276_v10 }
 0x5a2   :  { %3070 = vmatprep.subr.bf16.mxu0 %v3274_v3 }
 0x5a5   :  { %3072 = vmatpush3.bf16.msra.mxu0 %v3449_v49 }
 0x5a6   :  { %3079 = vmatprep.subr.bf16.mxu0 %v3274_v3 }
 0x669   :  { %v715_v47 = vpop.f32.mrb[6].mxu1 }
 0x66a   :  { %v2794_v50 = vpop.f32.mrb[7].mxu1 }
 0x66b   :  { %v640_v51 = vpop.f32.mrb[10].mxu0 }
 0x66c   :  { %v716_v52 = vadd.f32 %v715_v47, %v640_v51  ;;  %v2783_v53 = vpop.f32.mrb[11].mxu0 }
 0x66e   :  { %v719_v54 = vadd.f32 %v3512_v2, %v716_v52 }
 0x670   :  { %v720_v55 = vmul.f32 %v719_v54, %v3396_v21 }
 0x672   :  { %3194 = vtanh.f32 %v720_v55 }
 0x673   :  { %v808_v62 = vpop.f32.mrb[12].mxu0 }
 0x674   :  { %v812_v0 = vadd.f32 %v808_v62, %v171_v60  ;;  %v2805_v1 = vpop.f32.mrb[13].mxu0 }
 0x676   :  { %v813_v4 = vmul.f32 %v812_v0, %v3396_v21 }
 0x678   :  { %3196 = vtanh.f32 %v813_v4 }
 0x67c   :  { %v3195_v5 = vpop.eup %3194 }
 0x67d   :  { %v722_v6 = vmul.f32 0.5, %v3195_v5 }
 0x67f   :  { %v723_v8 = vadd.f32 0.5, %v722_v6 }
 0x681   :  { %v724_v9 = vsel %vm3389_vm4, %v3195_v5, %v723_v8 }
 0x682   :  { %v3197_v11 = vpop.eup %3196  ;;  %727 = vrot.lane.b32.xlu0 %v724_v9, %s3278_s3  ;;  %v725_v22 = vmul.f32 %v724_v9, %v469_v37 }
 0x683   :  { %v815_v13 = vmul.f32 0.5, %v3197_v11 }
 0x685   :  { %v816_v14 = vadd.f32 0.5, %v815_v13 }
 0x687   :  { %v817_v57 = vsel %vm3389_vm4, %v3197_v11, %v816_v14 }
 0x688   :  { %820 = vrot.lane.b32.xlu1 %v817_v57, %s3278_s3  ;;  %v818_v25 = vmul.f32 %v817_v57, %v3526_v33 }
 0x6f4   :  { %v728_v17 = vpop.permute.xlu0 %727 }
 0x6f5   :  { %v730_v16 = vmul.f32 %v728_v17, %v724_v9 }
 0x6f7   :  { %732 = vrot.lane.b32.xlu0 %v730_v16, %s3279_s14 }
 0x6fa   :  { %v821_v19 = vpop.permute.xlu1 %820 }
 0x6fb   :  { %v823_v20 = vmul.f32 %v821_v19, %v817_v57 }
 0x6fd   :  { %825 = vrot.lane.b32.xlu1 %v823_v20, %s3279_s14 }
 0x769   :  { %v733_v23 = vpop.permute.xlu0 %732 }
 0x76a   :  { %v3567_v24 = vadd.f32 %v733_v23, %v725_v22 }
 0x76c   :  { %3198 = vtanh.f32 %v3567_v24 }
 0x76f   :  { %v826_v26 = vpop.permute.xlu1 %825 }
 0x770   :  { %v3571_v27 = vadd.f32 %v826_v26, %v818_v25 }
 0x772   :  { %3200 = vtanh.f32 %v3571_v27 }
 0x776   :  { %v3199_v28 = vpop.eup %3198 }
 0x777   :  { %738 = vrot.lane.b32.xlu0 %v3199_v28, %s3278_s3 }
 0x77c   :  { %v3201_v29 = vpop.eup %3200 }
 0x77d   :  { %831 = vrot.lane.b32.xlu1 %v3201_v29, %s3278_s3 }
 0x7e9   :  { %v739_v30 = vpop.permute.xlu0 %738 }
 0x7ea   :  { %v741_v31 = vmul.f32 %v739_v30, %v724_v9 }
 0x7ec   :  { %836 = vrot.lane.b32.xlu0 %v741_v31, %s3279_s14 }
 0x7ef   :  { %v832_v32 = vpop.permute.xlu1 %831 }
 0x7f0   :  { %v834_v35 = vmul.f32 %v832_v32, %v817_v57 }
 0x7f2   :  { %911 = vrot.lane.b32.xlu1 %v834_v35, %s3279_s14  ;;  %v181_v35 = vadd.f32 %v3385_v15, %v3487_v59 }
 0x85e   :  { %v837_v33 = vpop.permute.xlu0 %836 }
 0x85f   :  { %2815 = vmatmul.mubr.msk.f32.vlgmr.msra.gmra.mrb[8].mxu1 %vm205_vm5, %v837_v33 }
 0x860   :  { %3075 = vmatpush3.bf16.msra.mxu1 %v3357_v7  ;;  %2836 = vmatprep.mubr.msk.f32.mxu1 %vm3275_vm1, %v3276_v10 }
 0x861   :  { %3076 = vmatprep.subr.bf16.mxu1 %v3274_v3 }
 0x864   :  { %v912_v36 = vpop.permute.xlu1 %911  ;;  %3078 = vmatpush3.bf16.msra.mxu1 %v3372_v12 }
 0x865   :  { %2826 = vmatmul.mubr.msk.f32.vlgmr.msra.gmra.mrb[14].mxu0 %vm205_vm5, %v912_v36  ;;  %3085 = vmatprep.subr.bf16.mxu1 %v3274_v3 }
 0x866   :  { %3081 = vmatpush3.bf16.msra.mxu0 %v3426_v42  ;;  %2847 = vmatprep.mubr.msk.f32.mxu0 %vm3275_vm1, %v3276_v10 }
 0x867   :  { %2837 = vmatmul.mubr.msk.f32.vlgmr.msra.gmra.mrb[10].mxu1 %vm205_vm5, %v912_v36  ;;  %3082 = vmatprep.subr.bf16.mxu0 %v3274_v3 }
 0x868   :  { %3087 = vmatpush3.bf16.msra.mxu1 %v3415_v38  ;;  %2858 = vmatprep.mubr.msk.f32.mxu1 %vm3275_vm1, %v3276_v10 }
 0x869   :  { %3088 = vmatprep.subr.bf16.mxu1 %v3274_v3 }
 0x86a   :  { %3084 = vmatpush3.bf16.msra.mxu0 %v3447_v48 }
 0x86b   :  { %3091 = vmatprep.subr.bf16.mxu0 %v3274_v3 }
 0x86c   :  { %3090 = vmatpush3.bf16.msra.mxu1 %v3449_v49 }
 0x86d   :  { %3097 = vmatprep.subr.bf16.mxu1 %v3274_v3 }
 0x932   :  { %v906_v37 = vpop.f32.mrb[8].mxu1 }
 0x933   :  { %v2816_v39 = vpop.f32.mrb[9].mxu1 }
 0x938   :  { %v981_v40 = vpop.f32.mrb[14].mxu0 }
 0x939   :  { %v982_v43 = vadd.f32 %v981_v40, %v906_v37  ;;  %v2827_v44 = vpop.f32.mrb[15].mxu0 }
 0x93a   :  { %v1074_v45 = vpop.f32.mrb[10].mxu1 }
 0x93b   :  { %v985_v34 = vadd.f32 %v3512_v2, %v982_v43  ;;  %v1078_v46 = vadd.f32 %v1074_v45, %v176_v41  ;;  %v2838_v47 = vpop.f32.mrb[11].mxu1 }
 0x93d   :  { %v986_v50 = vmul.f32 %v985_v34, %v3396_v21  ;;  %v1079_v51 = vmul.f32 %v1078_v46, %v3396_v21 }
 0x93f   :  { %3202 = vtanh.f32 %v986_v50 }
 0x940   :  { %3204 = vtanh.f32 %v1079_v51 }
 0x949   :  { %v3203_v52 = vpop.eup %3202 }
 0x94a   :  { %v3205_v53 = vpop.eup %3204  ;;  %v988_v54 = vmul.f32 0.5, %v3203_v52 }
 0x94b   :  { %v1081_v55 = vmul.f32 0.5, %v3205_v53 }
 0x94c   :  { %v989_v60 = vadd.f32 0.5, %v988_v54 }
 0x94d   :  { %v1082_v62 = vadd.f32 0.5, %v1081_v55 }
 0x94e   :  { %v990_v56 = vsel %vm3389_vm4, %v3203_v52, %v989_v60 }
 0x94f   :  { %993 = vrot.lane.b32.xlu0 %v990_v56, %s3278_s3  ;;  %v1083_v0 = vsel %vm3389_vm4, %v3205_v53, %v1082_v62  ;;  %v991_v8 = vmul.f32 %v990_v56, %v3567_v24 }
 0x950   :  { %1086 = vrot.lane.b32.xlu1 %v1083_v0, %s3278_s3  ;;  %v1084_v11 = vmul.f32 %v1083_v0, %v3571_v27 }
 0x9c1   :  { %v994_v1 = vpop.permute.xlu0 %993 }
 0x9c2   :  { %v996_v4 = vmul.f32 %v994_v1, %v990_v56  ;;  %v1087_v5 = vpop.permute.xlu1 %1086 }
 0x9c3   :  { %v1089_v6 = vmul.f32 %v1087_v5, %v1083_v0 }
 0x9c4   :  { %998 = vrot.lane.b32.xlu0 %v996_v4, %s3279_s14 }
 0x9c5   :  { %1091 = vrot.lane.b32.xlu1 %v1089_v6, %s3279_s14 }
 0xa36   :  { %v999_v9 = vpop.permute.xlu0 %998 }
 0xa37   :  { %v3614_v13 = vadd.f32 %v999_v9, %v991_v8  ;;  %v1092_v14 = vpop.permute.xlu1 %1091 }
 0xa38   :  { %v3616_v57 = vadd.f32 %v1092_v14, %v1084_v11 }
 0xa39   :  { %3206 = vtanh.f32 %v3614_v13 }
 0xa3a   :  { %3208 = vtanh.f32 %v3616_v57 }
 0xa43   :  { %v3207_v17 = vpop.eup %3206 }
 0xa44   :  { %v3209_v16 = vpop.eup %3208  ;;  %1004 = vrot.lane.b32.xlu0 %v3207_v17, %s3278_s3 }
 0xa45   :  { %1097 = vrot.lane.b32.xlu1 %v3209_v16, %s3278_s3 }
 0xab6   :  { %v1005_v19 = vpop.permute.xlu0 %1004 }
 0xab7   :  { %v1007_v20 = vmul.f32 %v1005_v19, %v990_v56  ;;  %v1098_v22 = vpop.permute.xlu1 %1097  ;;  %v186_v19 = vadd.f32 %v3485_v58, %v3385_v15 }
 0xab8   :  { %v1100_v23 = vmul.f32 %v1098_v22, %v1083_v0 }
 0xab9   :  { %1102 = vrot.lane.b32.xlu0 %v1007_v20, %s3279_s14 }
 0xaba   :  { %1177 = vrot.lane.b32.xlu1 %v1100_v23, %s3279_s14 }
 0xb2b   :  { %v1103_v24 = vpop.permute.xlu0 %1102 }
 0xb2c   :  { %v1178_v25 = vpop.permute.xlu1 %1177  ;;  %2848 = vmatmul.mubr.msk.f32.vlgmr.msra.gmra.mrb[16].mxu0 %vm205_vm5, %v1103_v24 }
 0xb2d   :  { %2859 = vmatmul.mubr.msk.f32.vlgmr.msra.gmra.mrb[12].mxu1 %vm205_vm5, %v1178_v25  ;;  %3093 = vmatpush3.bf16.msra.mxu0 %v3357_v7 }
 0xb2e   :  { %3094 = vmatprep.subr.bf16.mxu0 %v3274_v3  ;;  %2869 = vmatprep.mubr.msk.f32.mxu0 %vm3275_vm1, %v3276_v10 }
 0xb2f   :  { %3099 = vmatpush3.bf16.msra.mxu1 %v3426_v42  ;;  %2880 = vmatprep.mubr.msk.f32.mxu1 %vm3275_vm1, %v3276_v10 }
 0xb30   :  { %3100 = vmatprep.subr.bf16.mxu1 %v3274_v3 }
 0xb31   :  { %3096 = vmatpush3.bf16.msra.mxu0 %v3372_v12 }
 0xb32   :  { %3103 = vmatprep.subr.bf16.mxu0 %v3274_v3 }
 0xb33   :  { %3102 = vmatpush3.bf16.msra.mxu1 %v3447_v48 }
 0xb34   :  { %2870 = vmatmul.mubr.msk.f32.vlgmr.msra.gmra.mrb[18].mxu0 %vm205_vm5, %v1178_v25  ;;  %3109 = vmatprep.subr.bf16.mxu1 %v3274_v3 }
 0xb35   :  { %3105 = vmatpush3.bf16.msra.mxu0 %v3415_v38  ;;  %2891 = vmatprep.mubr.msk.f32.mxu0 %vm3275_vm1, %v3276_v10 }
 0xb36   :  { %3106 = vmatprep.subr.bf16.mxu0 %v3274_v3 }
 0xb39   :  { %3108 = vmatpush3.bf16.msra.mxu0 %v3449_v49 }
 0xb3a   :  { %3115 = vmatprep.subr.bf16.mxu0 %v3274_v3 }
 0xbff   :  { %v1172_v26 = vpop.f32.mrb[16].mxu0 }
 0xc00   :  { %v1247_v27 = vpop.f32.mrb[12].mxu1  ;;  %v2849_v28 = vpop.f32.mrb[17].mxu0 }
 0xc01   :  { %v1248_v29 = vadd.f32 %v1247_v27, %v1172_v26  ;;  %v2860_v30 = vpop.f32.mrb[13].mxu1 }
 0xc03   :  { %v1251_v31 = vadd.f32 %v3512_v2, %v1248_v29 }
 0xc05   :  { %v1252_v32 = vmul.f32 %v1251_v31, %v3396_v21 }
 0xc07   :  { %3210 = vtanh.f32 %v1252_v32  ;;  %v1340_v33 = vpop.f32.mrb[18].mxu0 }
 0xc08   :  { %v1344_v36 = vadd.f32 %v1340_v33, %v181_v35  ;;  %v2871_v37 = vpop.f32.mrb[19].mxu0 }
 0xc0a   :  { %v1345_v39 = vmul.f32 %v1344_v36, %v3396_v21 }
 0xc0c   :  { %3212 = vtanh.f32 %v1345_v39 }
 0xc11   :  { %v3211_v40 = vpop.eup %3210 }
 0xc12   :  { %v1254_v41 = vmul.f32 0.5, %v3211_v40 }
 0xc14   :  { %v1255_v43 = vadd.f32 0.5, %v1254_v41 }
 0xc16   :  { %v3213_v44 = vpop.eup %3212  ;;  %v1256_v45 = vsel %vm3389_vm4, %v3211_v40, %v1255_v43 }
 0xc17   :  { %1259 = vrot.lane.b32.xlu0 %v1256_v45, %s3278_s3  ;;  %v1347_v34 = vmul.f32 0.5, %v3213_v44  ;;  %v1257_v53 = vmul.f32 %v1256_v45, %v3614_v13 }
 0xc19   :  { %v1348_v46 = vadd.f32 0.5, %v1347_v34 }
 0xc1b   :  { %v1349_v59 = vsel %vm3389_vm4, %v3213_v44, %v1348_v46 }
 0xc1c   :  { %1352 = vrot.lane.b32.xlu1 %v1349_v59, %s3278_s3  ;;  %v1350_v60 = vmul.f32 %v1349_v59, %v3616_v57 }
 0xc89   :  { %v1260_v47 = vpop.permute.xlu0 %1259 }
 0xc8a   :  { %v1262_v50 = vmul.f32 %v1260_v47, %v1256_v45 }
 0xc8c   :  { %1264 = vrot.lane.b32.xlu0 %v1262_v50, %s3279_s14 }
 0xc8e   :  { %v1353_v51 = vpop.permute.xlu1 %1352 }
 0xc8f   :  { %v1355_v52 = vmul.f32 %v1353_v51, %v1349_v59 }
 0xc91   :  { %1357 = vrot.lane.b32.xlu1 %v1355_v52, %s3279_s14 }
 0xcfe   :  { %v1265_v54 = vpop.permute.xlu0 %1264 }
 0xcff   :  { %v3659_v55 = vadd.f32 %v1265_v54, %v1257_v53 }
 0xd01   :  { %3214 = vtanh.f32 %v3659_v55 }
 0xd03   :  { %v1358_v62 = vpop.permute.xlu1 %1357 }
 0xd04   :  { %v3663_v56 = vadd.f32 %v1358_v62, %v1350_v60 }
 0xd06   :  { %3216 = vtanh.f32 %v3663_v56 }
 0xd0b   :  { %v3215_v0 = vpop.eup %3214 }
 0xd0c   :  { %1270 = vrot.lane.b32.xlu0 %v3215_v0, %s3278_s3 }
 0xd10   :  { %v3217_v1 = vpop.eup %3216 }
 0xd11   :  { %1363 = vrot.lane.b32.xlu1 %v3217_v1, %s3278_s3 }
 0xd7e   :  { %v1271_v4 = vpop.permute.xlu0 %1270 }
 0xd7f   :  { %v1273_v5 = vmul.f32 %v1271_v4, %v1256_v45 }
 0xd81   :  { %1368 = vrot.lane.b32.xlu0 %v1273_v5, %s3279_s14  ;;  %v191_v5 = vadd.f32 %v3385_v15, %v3491_v63 }
 0xd83   :  { %v1364_v6 = vpop.permute.xlu1 %1363 }
 0xd84   :  { %v1366_v8 = vmul.f32 %v1364_v6, %v1349_v59 }
 0xd86   :  { %1443 = vrot.lane.b32.xlu1 %v1366_v8, %s3279_s14 }
 0xdf3   :  { %v1369_v9 = vpop.permute.xlu0 %1368 }
 0xdf4   :  { %2881 = vmatmul.mubr.msk.f32.vlgmr.msra.gmra.mrb[14].mxu1 %vm205_vm5, %v1369_v9 }
 0xdf5   :  { %3111 = vmatpush3.bf16.msra.mxu1 %v3357_v7  ;;  %2902 = vmatprep.mubr.msk.f32.mxu1 %vm3275_vm1, %v3276_v10 }
 0xdf6   :  { %3112 = vmatprep.subr.bf16.mxu1 %v3274_v3 }
 0xdf8   :  { %v1444_v11 = vpop.permute.xlu1 %1443 }
 0xdf9   :  { %3114 = vmatpush3.bf16.msra.mxu1 %v3372_v12  ;;  %2892 = vmatmul.mubr.msk.f32.vlgmr.msra.gmra.mrb[20].mxu0 %vm205_vm5, %v1444_v11 }
 0xdfa   :  { %3117 = vmatpush3.bf16.msra.mxu0 %v3426_v42  ;;  %3121 = vmatprep.subr.bf16.mxu1 %v3274_v3 }
 0xdfb   :  { %3118 = vmatprep.subr.bf16.mxu0 %v3274_v3  ;;  %2913 = vmatprep.mubr.msk.f32.mxu0 %vm3275_vm1, %v3276_v10 }
 0xdfc   :  { %2903 = vmatmul.mubr.msk.f32.vlgmr.msra.gmra.mrb[16].mxu1 %vm205_vm5, %v1444_v11 }
 0xdfd   :  { %3123 = vmatpush3.bf16.msra.mxu1 %v3415_v38  ;;  %2924 = vmatprep.mubr.msk.f32.mxu1 %vm3275_vm1, %v3276_v10 }
 0xdfe   :  { %3120 = vmatpush3.bf16.msra.mxu0 %v3447_v48  ;;  %3124 = vmatprep.subr.bf16.mxu1 %v3274_v3 }
 0xdff   :  { %3127 = vmatprep.subr.bf16.mxu0 %v3274_v3 }
 0xe01   :  { %3126 = vmatpush3.bf16.msra.mxu1 %v3449_v49 }
 0xe02   :  { %3133 = vmatprep.subr.bf16.mxu1 %v3274_v3 }
 0xec7   :  { %v1438_v13 = vpop.f32.mrb[14].mxu1 }
 0xec8   :  { %v2882_v14 = vpop.f32.mrb[15].mxu1 }
 0xecc   :  { %v1513_v57 = vpop.f32.mrb[20].mxu0 }
 0xecd   :  { %v1514_v17 = vadd.f32 %v1513_v57, %v1438_v13  ;;  %v2893_v16 = vpop.f32.mrb[21].mxu0 }
 0xecf   :  { %v1517_v20 = vadd.f32 %v3512_v2, %v1514_v17  ;;  %v1606_v22 = vpop.f32.mrb[16].mxu1 }
 0xed0   :  { %v1610_v23 = vadd.f32 %v1606_v22, %v186_v19  ;;  %v2904_v24 = vpop.f32.mrb[17].mxu1 }
 0xed1   :  { %v1518_v25 = vmul.f32 %v1517_v20, %v3396_v21 }
 0xed2   :  { %v1611_v26 = vmul.f32 %v1610_v23, %v3396_v21 }
 0xed3   :  { %3218 = vtanh.f32 %v1518_v25 }
 0xed4   :  { %3220 = vtanh.f32 %v1611_v26 }
 0xedd   :  { %v3219_v27 = vpop.eup %3218 }
 0xede   :  { %v3221_v28 = vpop.eup %3220  ;;  %v1520_v29 = vmul.f32 0.5, %v3219_v27 }
 0xedf   :  { %v1613_v30 = vmul.f32 0.5, %v3221_v28 }
 0xee0   :  { %v1521_v31 = vadd.f32 0.5, %v1520_v29 }
 0xee1   :  { %v1614_v32 = vadd.f32 0.5, %v1613_v30 }
 0xee2   :  { %v1522_v58 = vsel %vm3389_vm4, %v3219_v27, %v1521_v31 }
 0xee3   :  { %1525 = vrot.lane.b32.xlu0 %v1522_v58, %s3278_s3  ;;  %v1615_v35 = vsel %vm3389_vm4, %v3221_v28, %v1614_v32  ;;  %v1523_v40 = vmul.f32 %v1522_v58, %v3659_v55 }
 0xee4   :  { %1618 = vrot.lane.b32.xlu1 %v1615_v35, %s3278_s3  ;;  %v1616_v43 = vmul.f32 %v1615_v35, %v3663_v56 }
 0xf55   :  { %v1526_v33 = vpop.permute.xlu0 %1525 }
 0xf56   :  { %v1528_v36 = vmul.f32 %v1526_v33, %v1522_v58  ;;  %v1619_v37 = vpop.permute.xlu1 %1618 }
 0xf57   :  { %v1621_v39 = vmul.f32 %v1619_v37, %v1615_v35 }
 0xf58   :  { %1530 = vrot.lane.b32.xlu0 %v1528_v36, %s3279_s14 }
 0xf59   :  { %1623 = vrot.lane.b32.xlu1 %v1621_v39, %s3279_s14 }
 0xfca   :  { %v1531_v41 = vpop.permute.xlu0 %1530 }
 0xfcb   :  { %v3706_v44 = vadd.f32 %v1531_v41, %v1523_v40  ;;  %v1624_v45 = vpop.permute.xlu1 %1623 }
 0xfcc   :  { %v3708_v34 = vadd.f32 %v1624_v45, %v1616_v43 }
 0xfcd   :  { %3222 = vtanh.f32 %v3706_v44 }
 0xfce   :  { %3224 = vtanh.f32 %v3708_v34 }
 0xfd7   :  { %v3223_v46 = vpop.eup %3222 }
 0xfd8   :  { %v3225_v59 = vpop.eup %3224  ;;  %1536 = vrot.lane.b32.xlu0 %v3223_v46, %s3278_s3 }
 0xfd9   :  { %1629 = vrot.lane.b32.xlu1 %v3225_v59, %s3278_s3 }
0x104a   :  { %v1537_v47 = vpop.permute.xlu0 %1536 }
0x104b   :  { %v1539_v50 = vmul.f32 %v1537_v47, %v1522_v58  ;;  %v1630_v51 = vpop.permute.xlu1 %1629 }
0x104c   :  { %v1632_v52 = vmul.f32 %v1630_v51, %v1615_v35 }
0x104d   :  { %1634 = vrot.lane.b32.xlu0 %v1539_v50, %s3279_s14 }
0x104e   :  { %1709 = vrot.lane.b32.xlu1 %v1632_v52, %s3279_s14 }
0x10bf   :  { %v1635_v53 = vpop.permute.xlu0 %1634 }
0x10c0   :  { %v1710_v54 = vpop.permute.xlu1 %1709  ;;  %2914 = vmatmul.mubr.msk.f32.vlgmr.msra.gmra.mrb[22].mxu0 %vm205_vm5, %v1635_v53 }
0x10c1   :  { %2925 = vmatmul.mubr.msk.f32.vlgmr.msra.gmra.mrb[18].mxu1 %vm205_vm5, %v1710_v54  ;;  %3129 = vmatpush3.bf16.msra.mxu0 %v3357_v7 }
0x10c2   :  { %3130 = vmatprep.subr.bf16.mxu0 %v3274_v3  ;;  %2935 = vmatprep.mubr.msk.f32.mxu0 %vm3275_vm1, %v3276_v10 }
0x10c3   :  { %3135 = vmatpush3.bf16.msra.mxu1 %v3426_v42  ;;  %2946 = vmatprep.mubr.msk.f32.mxu1 %vm3275_vm1, %v3276_v10 }
0x10c4   :  { %3136 = vmatprep.subr.bf16.mxu1 %v3274_v3 }
0x10c5   :  { %3132 = vmatpush3.bf16.msra.mxu0 %v3372_v12 }
0x10c6   :  { %3139 = vmatprep.subr.bf16.mxu0 %v3274_v3 }
0x10c7   :  { %3138 = vmatpush3.bf16.msra.mxu1 %v3447_v48 }
0x10c8   :  { %2936 = vmatmul.mubr.msk.f32.vlgmr.msra.gmra.mrb[24].mxu0 %vm205_vm5, %v1710_v54  ;;  %3145 = vmatprep.subr.bf16.mxu1 %v3274_v3 }
0x10c9   :  { %3141 = vmatpush3.bf16.msra.mxu0 %v3415_v38  ;;  %2957 = vmatprep.mubr.msk.f32.mxu0 %vm3275_vm1, %v3276_v10 }
0x10ca   :  { %3142 = vmatprep.subr.bf16.mxu0 %v3274_v3 }
0x10cd   :  { %3144 = vmatpush3.bf16.msra.mxu0 %v3449_v49 }
0x10ce   :  { %3151 = vmatprep.subr.bf16.mxu0 %v3274_v3 }
0x1193   :  { %v1704_v55 = vpop.f32.mrb[22].mxu0 }
0x1194   :  { %v1779_v60 = vpop.f32.mrb[18].mxu1  ;;  %v2915_v62 = vpop.f32.mrb[23].mxu0 }
0x1195   :  { %v1780_v56 = vadd.f32 %v1779_v60, %v1704_v55  ;;  %v2926_v0 = vpop.f32.mrb[19].mxu1 }
0x1197   :  { %v1783_v1 = vadd.f32 %v3512_v2, %v1780_v56 }
0x1199   :  { %v1784_v4 = vmul.f32 %v1783_v1, %v3396_v21 }
0x119b   :  { %3226 = vtanh.f32 %v1784_v4  ;;  %v1872_v6 = vpop.f32.mrb[24].mxu0 }
0x119c   :  { %v1876_v8 = vadd.f32 %v1872_v6, %v191_v5  ;;  %v2937_v9 = vpop.f32.mrb[25].mxu0 }
0x119e   :  { %v1877_v11 = vmul.f32 %v1876_v8, %v3396_v21 }
0x11a0   :  { %3228 = vtanh.f32 %v1877_v11 }
0x11a5   :  { %v3227_v13 = vpop.eup %3226 }
0x11a6   :  { %v1786_v14 = vmul.f32 0.5, %v3227_v13 }
0x11a8   :  { %v1787_v57 = vadd.f32 0.5, %v1786_v14 }
0x11aa   :  { %v3229_v17 = vpop.eup %3228  ;;  %v1788_v16 = vsel %vm3389_vm4, %v3227_v13, %v1787_v57 }
0x11ab   :  { %1791 = vrot.lane.b32.xlu0 %v1788_v16, %s3278_s3  ;;  %v1879_v19 = vmul.f32 0.5, %v3229_v17  ;;  %v1789_v26 = vmul.f32 %v1788_v16, %v3706_v44 }
0x11ad   :  { %v1880_v20 = vadd.f32 0.5, %v1879_v19 }
0x11af   :  { %v1881_v63 = vsel %vm3389_vm4, %v3229_v17, %v1880_v20 }
0x11b0   :  { %1884 = vrot.lane.b32.xlu1 %v1881_v63, %s3278_s3  ;;  %v1882_v29 = vmul.f32 %v1881_v63, %v3708_v34 }
0x121d   :  { %v1792_v22 = vpop.permute.xlu0 %1791 }
0x121e   :  { %v1794_v23 = vmul.f32 %v1792_v22, %v1788_v16 }
0x1220   :  { %1796 = vrot.lane.b32.xlu0 %v1794_v23, %s3279_s14 }
0x1222   :  { %v1885_v24 = vpop.permute.xlu1 %1884 }
0x1223   :  { %v1887_v25 = vmul.f32 %v1885_v24, %v1881_v63 }
0x1225   :  { %1889 = vrot.lane.b32.xlu1 %v1887_v25, %s3279_s14 }
0x1292   :  { %v1797_v27 = vpop.permute.xlu0 %1796 }
0x1293   :  { %v3751_v28 = vadd.f32 %v1797_v27, %v1789_v26 }
0x1295   :  { %3230 = vtanh.f32 %v3751_v28 }
0x1297   :  { %v1890_v30 = vpop.permute.xlu1 %1889 }
0x1298   :  { %v3755_v31 = vadd.f32 %v1890_v30, %v1882_v29 }
0x129a   :  { %3232 = vtanh.f32 %v3755_v31 }
0x129f   :  { %v3231_v32 = vpop.eup %3230 }
0x12a0   :  { %1802 = vrot.lane.b32.xlu0 %v3231_v32, %s3278_s3 }
0x12a4   :  { %v3233_v58 = vpop.eup %3232 }
0x12a5   :  { %1895 = vrot.lane.b32.xlu1 %v3233_v58, %s3278_s3 }
0x1312   :  { %v1803_v35 = vpop.permute.xlu0 %1802 }
0x1313   :  { %v1805_v33 = vmul.f32 %v1803_v35, %v1788_v16 }
0x1315   :  { %1900 = vrot.lane.b32.xlu0 %v1805_v33, %s3279_s14  ;;  %v2341_v33 = vld [vmem:[%s3872_s7 + $0x18] sm:$0xff] }
0x1317   :  { %v1896_v36 = vpop.permute.xlu1 %1895 }
0x1318   :  { %v1898_v37 = vmul.f32 %v1896_v36, %v1881_v63  ;;  %v3167_v36 = vpack.c.bf16 %v2341_v33, %v2340_v18 }
0x131a   :  { %1975 = vrot.lane.b32.xlu1 %v1898_v37, %s3279_s14 }
0x1387   :  { %v1901_v39 = vpop.permute.xlu0 %1900 }
0x1388   :  { %2947 = vmatmul.mubr.msk.f32.vlgmr.msra.gmra.mrb[20].mxu1 %vm205_vm5, %v1901_v39  ;;  %v2425_v39 = vld [vmem:[%s3874_s9] sm:$0xff] }
0x1389   :  { %3147 = vmatpush3.bf16.msra.mxu1 %v3357_v7  ;;  %2968 = vmatprep.mubr.msk.f32.mxu1 %vm3275_vm1, %v3276_v10 }
0x138a   :  { %3148 = vmatprep.subr.bf16.mxu1 %v3274_v3 }
0x138c   :  { %v1976_v40 = vpop.permute.xlu1 %1975 }
0x138d   :  { %3150 = vmatpush3.bf16.msra.mxu1 %v3372_v12  ;;  %2958 = vmatmul.mubr.msk.f32.vlgmr.msra.gmra.mrb[26].mxu0 %vm205_vm5, %v1976_v40 }
0x138e   :  { %3157 = vmatprep.subr.bf16.mxu1 %v3274_v3  ;;  %3153 = vmatpush3.bf16.msra.mxu0 %v3426_v42 }
0x138f   :  { %3154 = vmatprep.subr.bf16.mxu0 %v3274_v3  ;;  %2979 = vmatprep.mubr.msk.f32.mxu0 %vm3275_vm1, %v3276_v10 }
0x1390   :  { %2969 = vmatmul.mubr.msk.f32.vlgmr.msra.gmra.mrb[22].mxu1 %vm205_vm5, %v1976_v40  ;;  %v2426_v40 = vld [vmem:[%s3874_s9 + $0x8] sm:$0xff] }
0x1391   :  { %3159 = vmatpush3.bf16.msra.mxu1 %v3415_v38  ;;  %2990 = vmatprep.mubr.msk.f32.mxu1 %vm3275_vm1, %v3276_v10  ;;  %v196_v38 = vadd.f32 %v3489_v61, %v3385_v15 }
0x1392   :  { %3160 = vmatprep.subr.bf16.mxu1 %v3274_v3  ;;  %3156 = vmatpush3.bf16.msra.mxu0 %v3447_v48 }
0x1393   :  { %3163 = vmatprep.subr.bf16.mxu0 %v3274_v3 }
0x1395   :  { %3162 = vmatpush3.bf16.msra.mxu1 %v3449_v49 }
0x1396   :  { %3169 = vmatprep.subr.bf16.mxu1 %v3274_v3 }
0x145b   :  { %v1970_v7 = vpop.f32.mrb[20].mxu1 }
0x145c   :  { %v2948_v12 = vpop.f32.mrb[21].mxu1 }
0x1460   :  { %v2045_v42 = vpop.f32.mrb[26].mxu0 }
0x1461   :  { %v2046_v41 = vadd.f32 %v2045_v42, %v1970_v7  ;;  %v2959_v43 = vpop.f32.mrb[27].mxu0  ;;  %v3170_v7 = vpack.c.bf16 %v2426_v40, %v2425_v39 }
0x1462   :  { %v2427_v43 = vld [vmem:[%s3874_s9 + $0x10] sm:$0xff] }
0x1463   :  { %v2049_v44 = vadd.f32 %v3512_v2, %v2046_v41  ;;  %v2138_v45 = vpop.f32.mrb[22].mxu1 }
0x1464   :  { %v2142_v34 = vadd.f32 %v2138_v45, %v196_v38  ;;  %v2970_v46 = vpop.f32.mrb[23].mxu1  ;;  %v2428_v38 = vld [vmem:[%s3874_s9 + $0x18] sm:$0xff] }
0x1465   :  { %v2050_v48 = vmul.f32 %v2049_v44, %v3396_v21  ;;  %v3173_v44 = vpack.c.bf16 %v2428_v38, %v2427_v43 }
0x1466   :  { %v2143_v59 = vmul.f32 %v2142_v34, %v3396_v21 }
0x1467   :  { %3234 = vtanh.f32 %v2050_v48 }
0x1468   :  { %3236 = vtanh.f32 %v2143_v59  ;;  %v2571_v59 = vld [vmem:[%s3875_s10] ss:$0 sm:$0xff] }
0x1471   :  { %v3235_v49 = vpop.eup %3234 }
0x1472   :  { %v3237_v47 = vpop.eup %3236  ;;  %v2052_v50 = vmul.f32 0.5, %v3235_v49 }
0x1473   :  { %v2145_v51 = vmul.f32 0.5, %v3237_v47 }
0x1474   :  { %v2053_v52 = vadd.f32 0.5, %v2052_v50 }
0x1475   :  { %v2146_v53 = vadd.f32 0.5, %v2145_v51 }
0x1476   :  { %v2054_v15 = vsel %vm3389_vm4, %v3235_v49, %v2053_v52 }
0x1477   :  { %2057 = vrot.lane.b32.xlu0 %v2054_v15, %s3278_s3  ;;  %v2147_v61 = vsel %vm3389_vm4, %v3237_v47, %v2146_v53  ;;  %v2055_v56 = vmul.f32 %v2054_v15, %v3751_v28 }
0x1478   :  { %2150 = vrot.lane.b32.xlu1 %v2147_v61, %s3278_s3  ;;  %v2148_v1 = vmul.f32 %v2147_v61, %v3755_v31 }
0x14e9   :  { %v2058_v54 = vpop.permute.xlu0 %2057 }
0x14ea   :  { %v2060_v55 = vmul.f32 %v2058_v54, %v2054_v15  ;;  %v2151_v60 = vpop.permute.xlu1 %2150 }
0x14eb   :  { %v2153_v62 = vmul.f32 %v2151_v60, %v2147_v61 }
0x14ec   :  { %2062 = vrot.lane.b32.xlu0 %v2060_v55, %s3279_s14 }
0x14ed   :  { %2155 = vrot.lane.b32.xlu1 %v2153_v62, %s3279_s14 }
0x155e   :  { %v2063_v0 = vpop.permute.xlu0 %2062 }
0x155f   :  { %v2065_v4 = vadd.f32 %v2063_v0, %v2055_v56  ;;  %v2156_v5 = vpop.permute.xlu1 %2155 }
0x1560   :  { %v2158_v6 = vadd.f32 %v2156_v5, %v2148_v1 }
0x1561   :  { %3238 = vtanh.f32 %v2065_v4 }
0x1562   :  { %3240 = vtanh.f32 %v2158_v6 }
0x156b   :  { %v3239_v8 = vpop.eup %3238 }
0x156c   :  { %v3241_v9 = vpop.eup %3240  ;;  %2068 = vrot.lane.b32.xlu0 %v3239_v8, %s3278_s3 }
0x156d   :  { %2161 = vrot.lane.b32.xlu1 %v3241_v9, %s3278_s3 }
0x15de   :  { %v2069_v11 = vpop.permute.xlu0 %2068 }
0x15df   :  { %v2071_v13 = vmul.f32 %v2069_v11, %v2054_v15  ;;  %v2162_v14 = vpop.permute.xlu1 %2161 }
0x15e0   :  { %v2164_v57 = vmul.f32 %v2162_v14, %v2147_v61 }
0x15e1   :  { %2166 = vrot.lane.b32.xlu0 %v2071_v13, %s3279_s14 }
0x15e2   :  { %2241 = vrot.lane.b32.xlu1 %v2164_v57, %s3279_s14 }
0x1653   :  { %v2167_v17 = vpop.permute.xlu0 %2166 }
0x1654   :  { %v2242_v16 = vpop.permute.xlu1 %2241  ;;  %2980 = vmatmul.mubr.msk.f32.vlgmr.msra.gmra.mrb[28].mxu0 %vm205_vm5, %v2167_v17 }
0x1655   :  { %2991 = vmatmul.mubr.msk.f32.vlgmr.msra.gmra.mrb[24].mxu1 %vm205_vm5, %v2242_v16  ;;  %3001 = vmatprep.mubr.msk.f32.mxu0 %vm3275_vm1, %v3276_v10 }
0x1656   :  { %3012 = vmatprep.mubr.msk.f32.mxu1 %vm3275_vm1, %v3276_v10  ;;  %3171 = vmatpush3.bf16.msra.mxu1 %v3170_v7 }
0x1657   :  { %3172 = vmatprep.subr.bf16.mxu1 %v3274_v3 }
0x165a   :  { %3174 = vmatpush3.bf16.msra.mxu1 %v3173_v44 }
0x1727   :  { %v2236_v19 = vpop.f32.mrb[28].mxu0 }
0x1728   :  { %v2311_v20 = vpop.f32.mrb[24].mxu1  ;;  %v2981_v63 = vpop.f32.mrb[29].mxu0 }
0x1729   :  { %v2312_v22 = vadd.f32 %v2311_v20, %v2236_v19  ;;  %v2992_v23 = vpop.f32.mrb[25].mxu1 }
0x172b   :  { %v2315_v24 = vadd.f32 %v3512_v2, %v2312_v22  ;;  %v2339_v2 = vld [vmem:[%s3872_s7 + $0x8] sm:$0xff] }
0x172d   :  { %v2316_v25 = vmul.f32 %v2315_v24, %v3396_v21  ;;  %v2338_v21 = vld [vmem:[%s3872_s7] sm:$0xff] }
0x172e   :  { %v3164_v35 = vpack.c.bf16 %v2339_v2, %v2338_v21 }
0x172f   :  { %3242 = vtanh.f32 %v2316_v25 }
0x1730   :  { %3165 = vmatpush3.bf16.msra.mxu0 %v3164_v35 }
0x1731   :  { %3166 = vmatprep.subr.bf16.mxu0 %v3274_v3  ;;  %v2569_v3 = vld [vmem:[%s3873_s8] ss:$0 sm:$0xff]  ;;  %s3280_s8 = smov [#allocation2]  }
0x1732   :  { %s2529_s9 = sshll.u32 %s3280_s8, 4  ;;  %s2530_s9 = int_to_ptr.vmem [resolvable:$true] %s2529_s9 }
0x1733   :  { %s3250_s10 = scalar_lea.vmem %s2530_s9, 128  ;;  %p3255_p1 = scmp.lt.s32.totalorder %s2530_s9, %s2530_s9 }
0x1734   :  { %3168 = vmatpush3.bf16.msra.mxu0 %v3167_v36  ;;  %p3251_p0 = scmp.ne.s32.totalorder %s2530_s9, %s3250_s10  ;;  %p3256_p2 = scmp.lt.s32.totalorder %s3250_s10, %s3250_s10 }
0x1736   :  { %p3257_p3 = por %p3256_p2, %p3255_p1 }
0x1738   :  { %p3258_p4 = pnand %p3257_p3, %p3251_p0 }
0x1739   :  { %v3243_v26 = vpop.eup %3242 }
0x173a   :  { %v2318_v27 = vmul.f32 0.5, %v3243_v26 }
0x173c   :  { %v2319_v28 = vadd.f32 0.5, %v2318_v27 }
0x173e   :  { %v2320_v29 = vsel %vm3389_vm4, %v3243_v26, %v2319_v28 }
0x173f   :  { %2323 = vrot.lane.b32.xlu0 %v2320_v29, %s3278_s3  ;;  %v2321_v31 = vmul.f32 %v2320_v29, %v2065_v4 }
0x17b1   :  { %v2324_v30 = vpop.permute.xlu0 %2323 }
0x17b2   :  { %v2326_v10 = vmul.f32 %v2324_v30, %v2320_v29 }
0x17b4   :  { %2328 = vrot.lane.b32.xlu1 %v2326_v10, %s3279_s14 }
0x1826   :  { %v2329_v32 = vpop.permute.xlu1 %2328 }
0x1827   :  { %v2331_v58 = vadd.f32 %v2329_v32, %v2321_v31 }
0x1829   :  { %3244 = vtanh.f32 %v2331_v58 }
0x1833   :  { %v3245_v37 = vpop.eup %3244 }
0x1834   :  { %2334 = vrot.lane.b32.xlu0 %v3245_v37, %s3278_s3 }
0x18a6   :  { %v2335_v12 = vpop.permute.xlu0 %2334 }
0x18a7   :  { %v2337_v42 = vmul.f32 %v2335_v12, %v2320_v29 }
0x18a9   :  { %2350 = vrot.lane.b32.xlu1 %v2337_v42, %s3279_s14 }
0x191b   :  { %v2351_v41 = vpop.permute.xlu1 %2350 }
0x191c   :  { %3002 = vmatmul.mubr.msk.f32.vlgmr.msra.gmra.mrb[30].mxu0 %vm205_vm5, %v2351_v41 }
0x19ef   :  { %v2420_v45 = vpop.f32.mrb[30].mxu0 }
0x19f0   :  { %v2421_v34 = vadd.f32 %v2569_v3, %v2420_v45  ;;  %v3003_v46 = vpop.f32.mrb[31].mxu0 }
0x19f2   :  { %v2424_v48 = vmax.f32 %v2421_v34, 0.0 }
0x19f4   :  { %3013 = vmatmul.mubr.msk.f32.vlgmr.msra.gmra.mrb[26].mxu1 %vm205_vm5, %v2424_v48 }
0x1ac7   :  { %v2505_v49 = vpop.f32.mrb[26].mxu1 }
0x1ac8   :  { %v2506_v47 = vadd.f32 %v2571_v59, %v2505_v49  ;;  %v3014_v50 = vpop.f32.mrb[27].mxu1 }
0x1aca   :  { %v2510_v51 = vsel %vm2509_vm6, %v2506_v47, -inf }
0x1acb   :  { %2511 = vmax.xlane.f32.xlu0 %v2510_v51 }
0x1b58   :  { %v2512_v52 = vpop.xlane.xlu0 %2511 }
0x1b59   :  { %v2513_v53 = vsub.f32 %v2506_v47, %v2512_v52 }
0x1b5b   :  { %v2514_v15 = vmul.f32 1.442695, %v2513_v53 }
0x1b5d   :  { %3246 = vpow2.f32 %v2514_v15 }
0x1b67   :  { %v3247_v61 = vpop.eup %3246 }
0x1b68   :  { %v2516_v54 = vsel %vm2509_vm6, %v3247_v61, 0.0 }
0x1b69   :  { %2517 = vadd.xlane.f32.xlu1 %v2516_v54 }
0x1bf6   :  { %v2518_v55 = vpop.xlane.xlu1 %2517 }
0x1bf7   :  { %3248 = vlog2.f32 %v2518_v55 }
0x1c01   :  { %v3249_v60 = vpop.eup %3248 }
0x1c02   :  { %v2520_v62 = vmul.f32 0.6931472, %v3249_v60 }
0x1c04   :  { %v2521_v56 = vsub.f32 %v2513_v53, %v2520_v62 }
0x1c06   :  { %2522 = vst.msk [vmem:[#allocation2] sm:$0xff] %vm2509_vm6, %v2521_v56 }
0x1c07   :  { %3261 = shalt.err (!%p3258_p4)
}
0x1c08   :  { %s3262_s4 = scalar_lea.hbm %s3876_s11, 128 }
0x1c09   :  { %p3263_p5 = scmp.ne.s32.totalorder %s3876_s11, %s3262_s4  ;;  %p3266_p6 = scmp.lt.u32.totalorder %s3262_s4, %s3876_s11 }
0x1c0b   :  { %p3268_p7 = pnand %p3266_p6, %p3263_p5 }
0x1c0d   :  { %3271 = shalt.err (!%p3268_p7)
}
0x1c0e   :  { %2532 = dma.vmem_to_hbm [thread:$0]  %s2530_s9, 128, %s3876_s11, [#allocation3]  }
0x1c0f   :  { %3272 = dma.done.wait [#allocation3], 128  }
0x1c10   :  { %3273 = vsyncadd [#allocation3], 4294967168 }
0x1c11   :  { %2536 = vsyncpa [#allocation3], 1 }

</bundles_post_ra>
